<compile_context>
chip_gen: v7x
topology: tpu7x:2x2x1
jax: 0.10.0
libtpu: 0.0.40
codegen_flags: <defaults>
</compile_context>

<pallas_src>
import math

import jax
import jax.numpy as jnp
from jax import lax
from jax.experimental import pallas as pl
from jax.experimental.pallas import tpu as pltpu

_CHUNK = 8  # scan chunk: slabs and y stores stay sublane-aligned


def _sigmoid(z):
    # exact sigmoid (correctness feedback: no approx reciprocal on gate paths)
    return 1.0 / (1.0 + jnp.exp(-z))


def _softplus(z):
    # numerically stable softplus
    return jnp.maximum(z, 0.0) + jnp.log1p(jnp.exp(-jnp.abs(z)))


def mamba_block_kernel(x_ref, w_in_ref, w_conv_ref, b_conv_ref, w_xp_ref,
                       b_dt_ref, neg_a_ref, w_out_ref,
                       o_ref,
                       h_s, cbuf_s, u_s, g_s, proj_s, dA_s, dBu_s, hs_s, y_s):
    # x_ref      : (BT, LT, DIM)  f32 input tile
    # w_in_ref   : (DIM, 2*DIN)   in_proj.weight^T, bf16
    # w_conv_ref : (DCONV, DIN)   depthwise conv taps (tap, channel), f32
    # b_conv_ref : (1, DIN)       conv bias, f32
    # w_xp_ref   : (DIN, PPROJ)   fused [W_delta | W_B | W_C | 0-pad], f32
    # b_dt_ref   : (1, DIN)       dt_proj bias, f32
    # neg_a_ref  : (N, DIN)       -exp(A_log)^T, f32
    # w_out_ref  : (DIN, DIM)     out_proj.weight^T, bf16
    BT, LT, DIM = x_ref.shape
    N, DIN = neg_a_ref.shape
    DCONV = w_conv_ref.shape[0]
    TAIL = DCONV - 1
    CH = dA_s.shape[0]
    M = BT * LT
    f32 = jnp.float32
    mm = w_in_ref.dtype                       # matmul dtype for in/out proj (bf16)

    # ---- init persistent state (scan state + conv tail) at the first L tile ----
    @pl.when(pl.program_id(1) == 0)
    def _():
        h_s[...] = jnp.zeros_like(h_s)
        cbuf_s[...] = jnp.zeros_like(cbuf_s)  # rows [8-TAIL .. 7] = causal zero pad

    # ---- in_proj over all BT*LT rows, gate stored immediately ------------------
    x2d = x_ref[...].reshape(M, DIM)
    xr = jnp.dot(x2d.astype(mm), w_in_ref[...], preferred_element_type=f32)  # (M, 2*DIN)
    res = xr[:, DIN:]
    g_s[...] = res * _sigmoid(res)            # gate; xr/res are dead past this point
    x_in = xr[:, :DIN]

    # ---- causal depthwise conv (per batch row; tail carried across L tiles) ----
    b_conv = b_conv_ref[...]
    wc = w_conv_ref[...]                      # (DCONV, DIN)
    for r in range(BT):                       # static, small
        cbuf_s[r, 8:8 + LT, :] = x_in[r * LT:(r + 1) * LT, :]
        xe = cbuf_s[r, :, :]                  # (LT + 8, DIN): rows [8-TAIL..7] = prev tail
        conv = jnp.broadcast_to(b_conv, (LT, DIN))
        for k in range(DCONV):                # static taps: out[t] += w[k]*x[t+k-TAIL]
            conv = conv + xe[8 - TAIL + k:8 - TAIL + k + LT, :] * wc[k:k + 1, :]
        # stash this tile's last TAIL rows of x_in for the next L tile
        cbuf_s[r, 8 - TAIL:8, :] = xe[8 + LT - TAIL:8 + LT, :]
        u_s[r * LT:(r + 1) * LT, :] = conv * _sigmoid(conv)   # SiLU

    # ---- fused x_proj (+ folded dt_proj): one lane-dense MXU pass --------------
    # f32 weights on the delta path (feeds exp in the scan); output is 256 lanes
    # wide so both scratch stores below are unmasked full lane tiles.
    proj = jnp.dot(u_s[...], w_xp_ref[...], preferred_element_type=f32)  # (M, PPROJ)
    proj_s[:, :DIN] = _softplus(proj[:, :DIN] + b_dt_ref[...])           # delta
    proj_s[:, DIN:] = proj[:, DIN:]                                      # [B | C | pad]

    # ---- selective scan: h_t = dA_t * h_{t-1} + dBu_t ; y_t = C_t . h_t --------
    neg_a = neg_a_ref[...]                    # (N, DIN) == -exp(A_log)^T
    n_chunks = LT // CH
    for r in range(BT):                       # independent scans per batch row
        def chunk_body(c, h):
            start = pl.multiple_of(r * LT + c * CH, CH)
            pr = proj_s[pl.ds(start, CH), :]                   # (CH, PPROJ)
            dl = pr[:, :DIN]                                   # delta   (CH, DIN)
            bc = pr[:, DIN:DIN + 2 * N]                        # [B | C] (CH, 2N)
            uu = u_s[pl.ds(start, CH), :]                      # (CH, DIN)
            # whole-chunk slabs: all exp pushes issued before the serial chain,
            # B/C broadcast once per chunk (no per-state lane extracts).
            dA_s[...] = jnp.exp(dl[:, None, :] * neg_a[None, :, :])     # (CH, N, DIN)
            dBu_s[...] = (dl * uu)[:, None, :] * bc[:, :N, None]        # (CH, N, DIN)
            # serial recurrence over time, vectorised across all N states
            for t in range(CH):               # static unroll; 2-vreg FMA per step
                h = dA_s[t] * h + dBu_s[t]
                hs_s[t] = h
            # y[t, :] = sum_n C[t, n] * h_t[n, :]  (slab multiply + sublane reduce)
            y_c = jnp.sum(hs_s[...] * bc[:, N:, None], axis=1)          # (CH, DIN)
            y_s[pl.ds(start, CH), :] = y_c                              # aligned slab
            return h
        h_s[r] = lax.fori_loop(0, n_chunks, chunk_body, h_s[r])

    # ---- skip, gate, out_proj ---------------------------------------------------
    # NOTE: the reference forward shadows the parameter D with deltaA.shape[2]
    # (`b, l, D, d_in = deltaA.shape`), i.e. D == d_inner; reproduced exactly.
    y = (y_s[...] + u_s[...] * jnp.float32(DIN)) * g_s[...]
    out = jnp.dot(y.astype(mm), w_out_ref[...], preferred_element_type=f32)  # (M, DIM)
    o_ref[...] = out.reshape(BT, LT, DIM).astype(o_ref.dtype)


def mamba_block(x, params, *, bt=1, lt=None, matmul_dtype=jnp.bfloat16):
    """x: (B, L, DIM) f32.  params (pre-transposed, as in MambaBlock.__init__):
    (w_in, w_conv, b_conv, w_x, w_dt, b_dt, a_logT, w_out)."""
    B, L, DIM = x.shape
    (w_in, w_conv, b_conv, w_x, w_dt, b_dt, a_logT, w_out) = params
    DTR, DIN = w_dt.shape
    N = a_logT.shape[0]
    if lt is None:
        lt = min(L, 128)
    assert B % bt == 0 and L % lt == 0 and lt % _CHUNK == 0

    f32 = jnp.float32
    mm = matmul_dtype

    # Fold dt_proj into x_proj and fuse with the B/C projection; zero-pad the
    # output columns to a 128-lane multiple:  u @ w_xp -> [delta_raw | B | C | 0].
    w_delta = jnp.dot(w_x[:, :DTR].astype(f32), w_dt.astype(f32))   # (DIN, DIN)
    w_bc = w_x[:, DTR:].astype(f32)                                 # (DIN, 2N)
    PPROJ = ((DIN + 2 * N + 127) // 128) * 128
    w_xp = jnp.zeros((DIN, PPROJ), f32)
    w_xp = w_xp.at[:, :DIN].set(w_delta).at[:, DIN:DIN + 2 * N].set(w_bc)
    neg_a = -jnp.exp(a_logT.astype(f32))                            # (N, DIN)

    kparams = (
        w_in.astype(mm),       # (DIM, 2*DIN)
        w_conv.astype(f32),    # (DCONV, DIN)
        b_conv.astype(f32),    # (1, DIN)
        w_xp,                  # (DIN, PPROJ) f32 (delta path kept in f32)
        b_dt.astype(f32),      # (1, DIN)
        neg_a,                 # (N, DIN)
        w_out.astype(mm),      # (DIN, DIM)
    )

    def full_spec(w):
        nd = w.ndim
        return pl.BlockSpec(w.shape, lambda b, l, _nd=nd: (0,) * _nd)

    # TODO(synk): for M >= 128 on the three GEMMs at real model sizes, pack more
    # batch rows per grid step (bt) and/or enlarge the L tile; weights could also
    # be single-buffered (constant index maps) to save VMEM at scale.
    return pl.pallas_call(
        mamba_block_kernel,
        out_shape=jax.ShapeDtypeStruct((B, L, DIM), jnp.float32),
        grid_spec=pltpu.PrefetchScalarGridSpec(
            num_scalar_prefetch=0,
            grid=(B // bt, L // lt),
            in_specs=[pl.BlockSpec((bt, lt, DIM), lambda b, l: (b, l, 0))]
                     + [full_spec(w) for w in kparams],
            out_specs=pl.BlockSpec((bt, lt, DIM), lambda b, l: (b, l, 0)),
            scratch_shapes=[
                pltpu.VMEM((bt, N, DIN), f32),         # h: scan state, carried over L
                pltpu.VMEM((bt, lt + 8, DIN), f32),    # conv buffer (+ causal tail)
                pltpu.VMEM((bt * lt, DIN), f32),       # u = silu(conv(x))
                pltpu.VMEM((bt * lt, DIN), f32),       # gate = silu(res)
                pltpu.VMEM((bt * lt, PPROJ), f32),     # [delta | B | C | pad]
                pltpu.VMEM((_CHUNK, N, DIN), f32),     # per-chunk dA = exp(delta*A)
                pltpu.VMEM((_CHUNK, N, DIN), f32),     # per-chunk dBu
                pltpu.VMEM((_CHUNK, N, DIN), f32),     # per-chunk state history
                pltpu.VMEM((bt * lt, DIN), f32),       # y (scan output)
            ],
        ),
        compiler_params=pltpu.CompilerParams(
            dimension_semantics=("parallel", "arbitrary"),  # batch ∥, L serial carry
            vmem_limit_bytes=64 * 1024 * 1024,
        ),
    )(x, *kparams)


if __name__ == "__main__":
    # ConfigMamba: dim=64, expand=2 -> d_inner=128, d_state=16,
    #              dt_rank=ceil(64/16)=4, d_conv=4, conv_bias=True, bias=False
    B, L = 2, 8
    DIM, EXPAND, D_STATE, D_CONV = 64, 2, 16, 4
    DIN = EXPAND * DIM
    DTR = math.ceil(DIM / 16)

    key = jax.random.PRNGKey(0)
    ks = jax.random.split(key, 8)

    def u_init(k, shape, fan_in):
        bound = 1.0 / math.sqrt(fan_in)
        return jax.random.uniform(k, shape, jnp.float32, -bound, bound)

    # deterministic synthetic parameters (shapes per MambaBlock.__init__, pre-transposed)
    w_in = u_init(ks[0], (DIM, 2 * DIN), DIM)            # in_proj (no bias)
    w_conv = u_init(ks[1], (D_CONV, DIN), D_CONV)        # conv1d weight (d_in,1,d_conv) -> (d_conv,d_in)
    b_conv = u_init(ks[2], (1, DIN), D_CONV)             # conv1d bias
    w_x = u_init(ks[3], (DIN, DTR + 2 * D_STATE), DIN)   # x_proj (no bias)
    w_dt = u_init(ks[4], (DTR, DIN), DTR)                # dt_proj weight
    b_dt = u_init(ks[5], (1, DIN), DTR)                  # dt_proj bias
    w_out = u_init(ks[6], (DIN, DIM), DIN)               # out_proj (no bias)
    a_logT = jnp.log(jnp.broadcast_to(
        jnp.arange(1, D_STATE + 1, dtype=jnp.float32)[:, None],
        (D_STATE, DIN)))                                 # A_log^T, (N, DIN)
    # self.D exists per __init__, but the reference forward shadows it with
    # d_inner (see kernel NOTE), so it is unused here.

    x = jax.random.normal(ks[7], (B, L, DIM), dtype=jnp.float32)
    params = (w_in, w_conv, b_conv, w_x, w_dt, b_dt, a_logT, w_out)

    out = mamba_block(x, params, bt=2, lt=8)
    jax.block_until_ready(out)
    assert out.shape == (B, L, DIM) and out.dtype == jnp.float32
    assert bool(jnp.all(jnp.isfinite(out)))
    print("KERNEL_OK")
</pallas_src>

<mosaic_0001>
module attributes {stable_mosaic.version = 11 : i64} {
  func.func @mamba_block_kernel(%arg0: i32, %arg1: i32, %arg2: memref<2x8x64xf32, #tpu.memory_space<vmem>>, %arg3: memref<64x256xbf16, #tpu.memory_space<vmem>>, %arg4: memref<4x128xf32, #tpu.memory_space<vmem>>, %arg5: memref<1x128xf32, #tpu.memory_space<vmem>>, %arg6: memref<128x256xf32, #tpu.memory_space<vmem>>, %arg7: memref<1x128xf32, #tpu.memory_space<vmem>>, %arg8: memref<16x128xf32, #tpu.memory_space<vmem>>, %arg9: memref<128x64xbf16, #tpu.memory_space<vmem>>, %arg10: memref<2x8x64xf32, #tpu.memory_space<vmem>>, %arg11: memref<2x16x128xf32, #tpu.memory_space<vmem>>, %arg12: memref<2x16x128xf32, #tpu.memory_space<vmem>>, %arg13: memref<16x128xf32, #tpu.memory_space<vmem>>, %arg14: memref<16x128xf32, #tpu.memory_space<vmem>>, %arg15: memref<16x256xf32, #tpu.memory_space<vmem>>, %arg16: memref<8x16x128xf32, #tpu.memory_space<vmem>>, %arg17: memref<8x16x128xf32, #tpu.memory_space<vmem>>, %arg18: memref<8x16x128xf32, #tpu.memory_space<vmem>>, %arg19: memref<16x128xf32, #tpu.memory_space<vmem>>) attributes {dimension_semantics = [#tpu.dimension_semantics<parallel>, #tpu.dimension_semantics<arbitrary>], iteration_bounds = array<i64: 1, 1>, scalar_prefetch = 0 : i64, scratch_operands = 9 : i64, tpu.core_type = #tpu.core_type<tc>, window_params = [{transform_indices = @transform_0, window_bounds = array<i64: 2, 8, 64>}, {pipeline_mode = #tpu.pipeline_mode<synchronous>, transform_indices = @transform_1, window_bounds = array<i64: 64, 256>}, {pipeline_mode = #tpu.pipeline_mode<synchronous>, transform_indices = @transform_2, window_bounds = array<i64: 4, 128>}, {pipeline_mode = #tpu.pipeline_mode<synchronous>, transform_indices = @transform_3, window_bounds = array<i64: 1, 128>}, {pipeline_mode = #tpu.pipeline_mode<synchronous>, transform_indices = @transform_4, window_bounds = array<i64: 128, 256>}, {pipeline_mode = #tpu.pipeline_mode<synchronous>, transform_indices = @transform_5, window_bounds = array<i64: 1, 128>}, {pipeline_mode = #tpu.pipeline_mode<synchronous>, transform_indices = @transform_6, window_bounds = array<i64: 16, 128>}, {pipeline_mode = #tpu.pipeline_mode<synchronous>, transform_indices = @transform_7, window_bounds = array<i64: 128, 64>}, {transform_indices = @transform_8, window_bounds = array<i64: 2, 8, 64>}]} {
    %c0_i32 = arith.constant 0 : i32
    %0 = arith.cmpi eq, %arg1, %c0_i32 : i32
    %1 = arith.extui %0 : i1 to i32
    %c0_i32_0 = arith.constant 0 : i32
    %2 = arith.cmpi ne, %1, %c0_i32_0 : i32
    scf.if %2 {
      %cst_249 = arith.constant 0.000000e+00 : f32
      %352 = vector.broadcast %cst_249 : f32 to vector<2x16x128xf32>
      %c0_250 = arith.constant 0 : index
      %c0_251 = arith.constant 0 : index
      %c0_252 = arith.constant 0 : index
      %353 = vector.load %arg11[%c0_250, %c0_251, %c0_252] : memref<2x16x128xf32, #tpu.memory_space<vmem>>, vector<2x16x128xf32>
      tpu.vector_store %arg11[%c0_250, %c0_251, %c0_252], %352 {strides = array<i32>} : memref<2x16x128xf32, #tpu.memory_space<vmem>>, vector<2x16x128xf32>,
      %cst_253 = arith.constant 0.000000e+00 : f32
      %354 = vector.broadcast %cst_253 : f32 to vector<2x16x128xf32>
      %c0_254 = arith.constant 0 : index
      %c0_255 = arith.constant 0 : index
      %c0_256 = arith.constant 0 : index
      %355 = vector.load %arg12[%c0_254, %c0_255, %c0_256] : memref<2x16x128xf32, #tpu.memory_space<vmem>>, vector<2x16x128xf32>
      tpu.vector_store %arg12[%c0_254, %c0_255, %c0_256], %354 {strides = array<i32>} : memref<2x16x128xf32, #tpu.memory_space<vmem>>, vector<2x16x128xf32>,
    } else {
    }
    %c0 = arith.constant 0 : index
    %c0_1 = arith.constant 0 : index
    %c0_2 = arith.constant 0 : index
    %3 = vector.load %arg2[%c0, %c0_1, %c0_2] : memref<2x8x64xf32, #tpu.memory_space<vmem>>, vector<2x8x64xf32>
    %4 = vector.shape_cast %3 : vector<2x8x64xf32> to vector<16x64xf32>
    %5 = arith.truncf %4 : vector<16x64xf32> to vector<16x64xbf16>
    %c0_3 = arith.constant 0 : index
    %c0_4 = arith.constant 0 : index
    %6 = vector.load %arg3[%c0_3, %c0_4] : memref<64x256xbf16, #tpu.memory_space<vmem>>, vector<64x256xbf16>
    %cst = arith.constant dense<0.000000e+00> : vector<16x256xf32>
    %7 = tpu.matmul %5, %6, %cst {dimension_numbers = #tpu.dot_dimension_numbers<[1], [0], [0], [1], [0, 0, 1, 1], [], []>} : vector<16x64xbf16>, vector<64x256xbf16>, vector<16x256xf32> -> vector<16x256xf32>
    %8 = vector.extract_strided_slice %7 {offsets = [0, 128], sizes = [16, 128], strides = [1, 1]} : vector<16x256xf32> to vector<16x128xf32>
    %cst_5 = arith.constant 0.000000e+00 : f32
    %9 = vector.broadcast %cst_5 : f32 to vector<16x128xf32>
    %10 = arith.subf %9, %8 : vector<16x128xf32>
    %11 = math.exp %10 : vector<16x128xf32>
    %cst_6 = arith.constant 1.000000e+00 : f32
    %12 = vector.broadcast %cst_6 : f32 to vector<16x128xf32>
    %13 = arith.addf %12, %11 : vector<16x128xf32>
    %cst_7 = arith.constant 1.000000e+00 : f32
    %14 = vector.broadcast %cst_7 : f32 to vector<16x128xf32>
    %15 = arith.divf %14, %13 : vector<16x128xf32>
    %16 = arith.mulf %8, %15 : vector<16x128xf32>
    %c0_8 = arith.constant 0 : index
    %c0_9 = arith.constant 0 : index
    %17 = vector.load %arg14[%c0_8, %c0_9] : memref<16x128xf32, #tpu.memory_space<vmem>>, vector<16x128xf32>
    tpu.vector_store %arg14[%c0_8, %c0_9], %16 {strides = array<i32>} : memref<16x128xf32, #tpu.memory_space<vmem>>, vector<16x128xf32>,
    %18 = vector.extract_strided_slice %7 {offsets = [0, 0], sizes = [16, 128], strides = [1, 1]} : vector<16x256xf32> to vector<16x128xf32>
    %c0_10 = arith.constant 0 : index
    %c0_11 = arith.constant 0 : index
    %19 = vector.load %arg5[%c0_10, %c0_11] : memref<1x128xf32, #tpu.memory_space<vmem>>, vector<1x128xf32>
    %c0_12 = arith.constant 0 : index
    %c0_13 = arith.constant 0 : index
    %20 = vector.load %arg4[%c0_12, %c0_13] : memref<4x128xf32, #tpu.memory_space<vmem>>, vector<4x128xf32>
    %21 = vector.extract_strided_slice %18 {offsets = [0, 0], sizes = [8, 128], strides = [1, 1]} : vector<16x128xf32> to vector<8x128xf32>
    %c0_14 = arith.constant 0 : index
    %c8 = arith.constant 8 : index
    %c0_15 = arith.constant 0 : index
    %22 = vector.load %arg12[%c0_14, %c8, %c0_15] : memref<2x16x128xf32, #tpu.memory_space<vmem>>, vector<1x8x128xf32>
    %23 = vector.shape_cast %22 : vector<1x8x128xf32> to vector<8x128xf32>
    %24 = vector.shape_cast %21 : vector<8x128xf32> to vector<1x8x128xf32>
    tpu.vector_store %arg12[%c0_14, %c8, %c0_15], %24 {strides = array<i32>} : memref<2x16x128xf32, #tpu.memory_space<vmem>>, vector<1x8x128xf32>,
    %c0_16 = arith.constant 0 : index
    %c0_17 = arith.constant 0 : index
    %c0_18 = arith.constant 0 : index
    %25 = vector.load %arg12[%c0_16, %c0_17, %c0_18] : memref<2x16x128xf32, #tpu.memory_space<vmem>>, vector<1x16x128xf32>
    %26 = vector.shape_cast %25 : vector<1x16x128xf32> to vector<16x128xf32>
    %27 = vector.shape_cast %19 : vector<1x128xf32> to vector<1x128xf32>
    %28 = vector.broadcast %27 : vector<1x128xf32> to vector<8x128xf32>
    %29 = vector.extract_strided_slice %26 {offsets = [5, 0], sizes = [8, 128], strides = [1, 1]} : vector<16x128xf32> to vector<8x128xf32>
    %30 = vector.extract_strided_slice %20 {offsets = [0, 0], sizes = [1, 128], strides = [1, 1]} : vector<4x128xf32> to vector<1x128xf32>
    %31 = vector.broadcast %30 : vector<1x128xf32> to vector<8x128xf32>
    %32 = arith.mulf %29, %31 : vector<8x128xf32>
    %33 = arith.addf %28, %32 : vector<8x128xf32>
    %34 = vector.extract_strided_slice %26 {offsets = [6, 0], sizes = [8, 128], strides = [1, 1]} : vector<16x128xf32> to vector<8x128xf32>
    %35 = vector.extract_strided_slice %20 {offsets = [1, 0], sizes = [1, 128], strides = [1, 1]} : vector<4x128xf32> to vector<1x128xf32>
    %36 = vector.broadcast %35 : vector<1x128xf32> to vector<8x128xf32>
    %37 = arith.mulf %34, %36 : vector<8x128xf32>
    %38 = arith.addf %33, %37 : vector<8x128xf32>
    %39 = vector.extract_strided_slice %26 {offsets = [7, 0], sizes = [8, 128], strides = [1, 1]} : vector<16x128xf32> to vector<8x128xf32>
    %40 = vector.extract_strided_slice %20 {offsets = [2, 0], sizes = [1, 128], strides = [1, 1]} : vector<4x128xf32> to vector<1x128xf32>
    %41 = vector.broadcast %40 : vector<1x128xf32> to vector<8x128xf32>
    %42 = arith.mulf %39, %41 : vector<8x128xf32>
    %43 = arith.addf %38, %42 : vector<8x128xf32>
    %44 = vector.extract_strided_slice %26 {offsets = [8, 0], sizes = [8, 128], strides = [1, 1]} : vector<16x128xf32> to vector<8x128xf32>
    %45 = vector.extract_strided_slice %20 {offsets = [3, 0], sizes = [1, 128], strides = [1, 1]} : vector<4x128xf32> to vector<1x128xf32>
    %46 = vector.broadcast %45 : vector<1x128xf32> to vector<8x128xf32>
    %47 = arith.mulf %44, %46 : vector<8x128xf32>
    %48 = arith.addf %43, %47 : vector<8x128xf32>
    %49 = vector.extract_strided_slice %26 {offsets = [13, 0], sizes = [3, 128], strides = [1, 1]} : vector<16x128xf32> to vector<3x128xf32>
    %c0_19 = arith.constant 0 : index
    %c5 = arith.constant 5 : index
    %c0_20 = arith.constant 0 : index
    %50 = vector.load %arg12[%c0_19, %c5, %c0_20] : memref<2x16x128xf32, #tpu.memory_space<vmem>>, vector<1x3x128xf32>
    %51 = vector.shape_cast %50 : vector<1x3x128xf32> to vector<3x128xf32>
    %52 = vector.shape_cast %49 : vector<3x128xf32> to vector<1x3x128xf32>
    tpu.vector_store %arg12[%c0_19, %c5, %c0_20], %52 {strides = array<i32>} : memref<2x16x128xf32, #tpu.memory_space<vmem>>, vector<1x3x128xf32>,
    %cst_21 = arith.constant 0.000000e+00 : f32
    %53 = vector.broadcast %cst_21 : f32 to vector<8x128xf32>
    %54 = arith.subf %53, %48 : vector<8x128xf32>
    %55 = math.exp %54 : vector<8x128xf32>
    %cst_22 = arith.constant 1.000000e+00 : f32
    %56 = vector.broadcast %cst_22 : f32 to vector<8x128xf32>
    %57 = arith.addf %56, %55 : vector<8x128xf32>
    %cst_23 = arith.constant 1.000000e+00 : f32
    %58 = vector.broadcast %cst_23 : f32 to vector<8x128xf32>
    %59 = arith.divf %58, %57 : vector<8x128xf32>
    %60 = arith.mulf %48, %59 : vector<8x128xf32>
    %c0_24 = arith.constant 0 : index
    %c0_25 = arith.constant 0 : index
    %61 = vector.load %arg13[%c0_24, %c0_25] : memref<16x128xf32, #tpu.memory_space<vmem>>, vector<8x128xf32>
    tpu.vector_store %arg13[%c0_24, %c0_25], %60 {strides = array<i32>} : memref<16x128xf32, #tpu.memory_space<vmem>>, vector<8x128xf32>,
    %62 = vector.extract_strided_slice %18 {offsets = [8, 0], sizes = [8, 128], strides = [1, 1]} : vector<16x128xf32> to vector<8x128xf32>
    %c1 = arith.constant 1 : index
    %c8_26 = arith.constant 8 : index
    %c0_27 = arith.constant 0 : index
    %63 = vector.load %arg12[%c1, %c8_26, %c0_27] : memref<2x16x128xf32, #tpu.memory_space<vmem>>, vector<1x8x128xf32>
    %64 = vector.shape_cast %63 : vector<1x8x128xf32> to vector<8x128xf32>
    %65 = vector.shape_cast %62 : vector<8x128xf32> to vector<1x8x128xf32>
    tpu.vector_store %arg12[%c1, %c8_26, %c0_27], %65 {strides = array<i32>} : memref<2x16x128xf32, #tpu.memory_space<vmem>>, vector<1x8x128xf32>,
    %c1_28 = arith.constant 1 : index
    %c0_29 = arith.constant 0 : index
    %c0_30 = arith.constant 0 : index
    %66 = vector.load %arg12[%c1_28, %c0_29, %c0_30] : memref<2x16x128xf32, #tpu.memory_space<vmem>>, vector<1x16x128xf32>
    %67 = vector.shape_cast %66 : vector<1x16x128xf32> to vector<16x128xf32>
    %68 = vector.shape_cast %19 : vector<1x128xf32> to vector<1x128xf32>
    %69 = vector.broadcast %68 : vector<1x128xf32> to vector<8x128xf32>
    %70 = vector.extract_strided_slice %67 {offsets = [5, 0], sizes = [8, 128], strides = [1, 1]} : vector<16x128xf32> to vector<8x128xf32>
    %71 = vector.extract_strided_slice %20 {offsets = [0, 0], sizes = [1, 128], strides = [1, 1]} : vector<4x128xf32> to vector<1x128xf32>
    %72 = vector.broadcast %71 : vector<1x128xf32> to vector<8x128xf32>
    %73 = arith.mulf %70, %72 : vector<8x128xf32>
    %74 = arith.addf %69, %73 : vector<8x128xf32>
    %75 = vector.extract_strided_slice %67 {offsets = [6, 0], sizes = [8, 128], strides = [1, 1]} : vector<16x128xf32> to vector<8x128xf32>
    %76 = vector.extract_strided_slice %20 {offsets = [1, 0], sizes = [1, 128], strides = [1, 1]} : vector<4x128xf32> to vector<1x128xf32>
    %77 = vector.broadcast %76 : vector<1x128xf32> to vector<8x128xf32>
    %78 = arith.mulf %75, %77 : vector<8x128xf32>
    %79 = arith.addf %74, %78 : vector<8x128xf32>
    %80 = vector.extract_strided_slice %67 {offsets = [7, 0], sizes = [8, 128], strides = [1, 1]} : vector<16x128xf32> to vector<8x128xf32>
    %81 = vector.extract_strided_slice %20 {offsets = [2, 0], sizes = [1, 128], strides = [1, 1]} : vector<4x128xf32> to vector<1x128xf32>
    %82 = vector.broadcast %81 : vector<1x128xf32> to vector<8x128xf32>
    %83 = arith.mulf %80, %82 : vector<8x128xf32>
    %84 = arith.addf %79, %83 : vector<8x128xf32>
    %85 = vector.extract_strided_slice %67 {offsets = [8, 0], sizes = [8, 128], strides = [1, 1]} : vector<16x128xf32> to vector<8x128xf32>
    %86 = vector.extract_strided_slice %20 {offsets = [3, 0], sizes = [1, 128], strides = [1, 1]} : vector<4x128xf32> to vector<1x128xf32>
    %87 = vector.broadcast %86 : vector<1x128xf32> to vector<8x128xf32>
    %88 = arith.mulf %85, %87 : vector<8x128xf32>
    %89 = arith.addf %84, %88 : vector<8x128xf32>
    %90 = vector.extract_strided_slice %67 {offsets = [13, 0], sizes = [3, 128], strides = [1, 1]} : vector<16x128xf32> to vector<3x128xf32>
    %c1_31 = arith.constant 1 : index
    %c5_32 = arith.constant 5 : index
    %c0_33 = arith.constant 0 : index
    %91 = vector.load %arg12[%c1_31, %c5_32, %c0_33] : memref<2x16x128xf32, #tpu.memory_space<vmem>>, vector<1x3x128xf32>
    %92 = vector.shape_cast %91 : vector<1x3x128xf32> to vector<3x128xf32>
    %93 = vector.shape_cast %90 : vector<3x128xf32> to vector<1x3x128xf32>
    tpu.vector_store %arg12[%c1_31, %c5_32, %c0_33], %93 {strides = array<i32>} : memref<2x16x128xf32, #tpu.memory_space<vmem>>, vector<1x3x128xf32>,
    %cst_34 = arith.constant 0.000000e+00 : f32
    %94 = vector.broadcast %cst_34 : f32 to vector<8x128xf32>
    %95 = arith.subf %94, %89 : vector<8x128xf32>
    %96 = math.exp %95 : vector<8x128xf32>
    %cst_35 = arith.constant 1.000000e+00 : f32
    %97 = vector.broadcast %cst_35 : f32 to vector<8x128xf32>
    %98 = arith.addf %97, %96 : vector<8x128xf32>
    %cst_36 = arith.constant 1.000000e+00 : f32
    %99 = vector.broadcast %cst_36 : f32 to vector<8x128xf32>
    %100 = arith.divf %99, %98 : vector<8x128xf32>
    %101 = arith.mulf %89, %100 : vector<8x128xf32>
    %c8_37 = arith.constant 8 : index
    %c0_38 = arith.constant 0 : index
    %102 = vector.load %arg13[%c8_37, %c0_38] : memref<16x128xf32, #tpu.memory_space<vmem>>, vector<8x128xf32>
    tpu.vector_store %arg13[%c8_37, %c0_38], %101 {strides = array<i32>} : memref<16x128xf32, #tpu.memory_space<vmem>>, vector<8x128xf32>,
    %c0_39 = arith.constant 0 : index
    %c0_40 = arith.constant 0 : index
    %103 = vector.load %arg13[%c0_39, %c0_40] : memref<16x128xf32, #tpu.memory_space<vmem>>, vector<16x128xf32>
    %c0_41 = arith.constant 0 : index
    %c0_42 = arith.constant 0 : index
    %104 = vector.load %arg6[%c0_41, %c0_42] : memref<128x256xf32, #tpu.memory_space<vmem>>, vector<128x256xf32>
    %cst_43 = arith.constant dense<0.000000e+00> : vector<16x256xf32>
    %105 = tpu.matmul %103, %104, %cst_43 {dimension_numbers = #tpu.dot_dimension_numbers<[1], [0], [0], [1], [0, 0, 1, 1], [], []>} : vector<16x128xf32>, vector<128x256xf32>, vector<16x256xf32> -> vector<16x256xf32>
    %106 = vector.extract_strided_slice %105 {offsets = [0, 0], sizes = [16, 128], strides = [1, 1]} : vector<16x256xf32> to vector<16x128xf32>
    %c0_44 = arith.constant 0 : index
    %c0_45 = arith.constant 0 : index
    %107 = vector.load %arg7[%c0_44, %c0_45] : memref<1x128xf32, #tpu.memory_space<vmem>>, vector<1x128xf32>
    %108 = vector.broadcast %107 : vector<1x128xf32> to vector<16x128xf32>
    %109 = arith.addf %106, %108 : vector<16x128xf32>
    %cst_46 = arith.constant 0.000000e+00 : f32
    %110 = vector.broadcast %cst_46 : f32 to vector<16x128xf32>
    %111 = arith.maximumf %109, %110 : vector<16x128xf32>
    %112 = math.absf %109 : vector<16x128xf32>
    %cst_47 = arith.constant 0.000000e+00 : f32
    %113 = vector.broadcast %cst_47 : f32 to vector<16x128xf32>
    %114 = arith.subf %113, %112 : vector<16x128xf32>
    %115 = math.exp %114 : vector<16x128xf32>
    %116 = math.log1p %115 : vector<16x128xf32>
    %117 = arith.addf %111, %116 : vector<16x128xf32>
    %c0_48 = arith.constant 0 : index
    %c0_49 = arith.constant 0 : index
    %118 = vector.load %arg15[%c0_48, %c0_49] : memref<16x256xf32, #tpu.memory_space<vmem>>, vector<16x128xf32>
    tpu.vector_store %arg15[%c0_48, %c0_49], %117 {strides = array<i32>} : memref<16x256xf32, #tpu.memory_space<vmem>>, vector<16x128xf32>,
    %119 = vector.extract_strided_slice %105 {offsets = [0, 128], sizes = [16, 128], strides = [1, 1]} : vector<16x256xf32> to vector<16x128xf32>
    %c0_50 = arith.constant 0 : index
    %c128 = arith.constant 128 : index
    %120 = vector.load %arg15[%c0_50, %c128] : memref<16x256xf32, #tpu.memory_space<vmem>>, vector<16x128xf32>
    tpu.vector_store %arg15[%c0_50, %c128], %119 {strides = array<i32>} : memref<16x256xf32, #tpu.memory_space<vmem>>, vector<16x128xf32>,
    %c0_51 = arith.constant 0 : index
    %c0_52 = arith.constant 0 : index
    %121 = vector.load %arg8[%c0_51, %c0_52] : memref<16x128xf32, #tpu.memory_space<vmem>>, vector<16x128xf32>
    %c0_53 = arith.constant 0 : index
    %c0_54 = arith.constant 0 : index
    %c0_55 = arith.constant 0 : index
    %122 = vector.load %arg11[%c0_53, %c0_54, %c0_55] : memref<2x16x128xf32, #tpu.memory_space<vmem>>, vector<1x16x128xf32>
    %123 = vector.shape_cast %122 : vector<1x16x128xf32> to vector<16x128xf32>
    %c0_i32_56 = arith.constant 0 : i32
    %c8_i32 = arith.constant 8 : i32
    %124 = arith.muli %c0_i32_56, %c8_i32 : i32
    %c0_i32_57 = arith.constant 0 : i32
    %125 = arith.addi %c0_i32_57, %124 : i32
    %126 = tpu.assume_multiple %125, 8 : i32
    %127 = arith.index_cast %126 : i32 to index
    %c0_58 = arith.constant 0 : index
    %128 = vector.load %arg15[%127, %c0_58] : memref<16x256xf32, #tpu.memory_space<vmem>>, vector<8x256xf32>
    %129 = vector.extract_strided_slice %128 {offsets = [0, 0], sizes = [8, 128], strides = [1, 1]} : vector<8x256xf32> to vector<8x128xf32>
    %130 = vector.extract_strided_slice %128 {offsets = [0, 128], sizes = [8, 32], strides = [1, 1]} : vector<8x256xf32> to vector<8x32xf32>
    %131 = arith.index_cast %126 : i32 to index
    %c0_59 = arith.constant 0 : index
    %132 = vector.load %arg13[%131, %c0_59] : memref<16x128xf32, #tpu.memory_space<vmem>>, vector<8x128xf32>
    %133 = vector.shape_cast %129 : vector<8x128xf32> to vector<8x1x128xf32>
    %134 = vector.shape_cast %121 : vector<16x128xf32> to vector<1x16x128xf32>
    %135 = vector.broadcast %133 : vector<8x1x128xf32> to vector<8x16x128xf32>
    %136 = vector.broadcast %134 : vector<1x16x128xf32> to vector<8x16x128xf32>
    %137 = arith.mulf %135, %136 : vector<8x16x128xf32>
    %138 = math.exp %137 : vector<8x16x128xf32>
    %c0_60 = arith.constant 0 : index
    %c0_61 = arith.constant 0 : index
    %c0_62 = arith.constant 0 : index
    %139 = vector.load %arg16[%c0_60, %c0_61, %c0_62] : memref<8x16x128xf32, #tpu.memory_space<vmem>>, vector<8x16x128xf32>
    tpu.vector_store %arg16[%c0_60, %c0_61, %c0_62], %138 {strides = array<i32>} : memref<8x16x128xf32, #tpu.memory_space<vmem>>, vector<8x16x128xf32>,
    %140 = arith.mulf %129, %132 : vector<8x128xf32>
    %141 = vector.shape_cast %140 : vector<8x128xf32> to vector<8x1x128xf32>
    %142 = vector.extract_strided_slice %130 {offsets = [0, 0], sizes = [8, 16], strides = [1, 1]} : vector<8x32xf32> to vector<8x16xf32>
    %143 = vector.shape_cast %142 : vector<8x16xf32> to vector<8x16x1xf32>
    %144 = vector.broadcast %141 : vector<8x1x128xf32> to vector<8x16x128xf32>
    %145 = vector.broadcast %143 : vector<8x16x1xf32> to vector<8x16x128xf32>
    %146 = arith.mulf %144, %145 : vector<8x16x128xf32>
    %c0_63 = arith.constant 0 : index
    %c0_64 = arith.constant 0 : index
    %c0_65 = arith.constant 0 : index
    %147 = vector.load %arg17[%c0_63, %c0_64, %c0_65] : memref<8x16x128xf32, #tpu.memory_space<vmem>>, vector<8x16x128xf32>
    tpu.vector_store %arg17[%c0_63, %c0_64, %c0_65], %146 {strides = array<i32>} : memref<8x16x128xf32, #tpu.memory_space<vmem>>, vector<8x16x128xf32>,
    %c0_66 = arith.constant 0 : index
    %c0_67 = arith.constant 0 : index
    %c0_68 = arith.constant 0 : index
    %148 = vector.load %arg16[%c0_66, %c0_67, %c0_68] : memref<8x16x128xf32, #tpu.memory_space<vmem>>, vector<1x16x128xf32>
    %149 = vector.shape_cast %148 : vector<1x16x128xf32> to vector<16x128xf32>
    %150 = arith.mulf %149, %123 : vector<16x128xf32>
    %c0_69 = arith.constant 0 : index
    %c0_70 = arith.constant 0 : index
    %c0_71 = arith.constant 0 : index
    %151 = vector.load %arg17[%c0_69, %c0_70, %c0_71] : memref<8x16x128xf32, #tpu.memory_space<vmem>>, vector<1x16x128xf32>
    %152 = vector.shape_cast %151 : vector<1x16x128xf32> to vector<16x128xf32>
    %153 = arith.addf %150, %152 : vector<16x128xf32>
    %c0_72 = arith.constant 0 : index
    %c0_73 = arith.constant 0 : index
    %c0_74 = arith.constant 0 : index
    %154 = vector.load %arg18[%c0_72, %c0_73, %c0_74] : memref<8x16x128xf32, #tpu.memory_space<vmem>>, vector<1x16x128xf32>
    %155 = vector.shape_cast %154 : vector<1x16x128xf32> to vector<16x128xf32>
    %156 = vector.shape_cast %153 : vector<16x128xf32> to vector<1x16x128xf32>
    tpu.vector_store %arg18[%c0_72, %c0_73, %c0_74], %156 {strides = array<i32>} : memref<8x16x128xf32, #tpu.memory_space<vmem>>, vector<1x16x128xf32>,
    %c1_75 = arith.constant 1 : index
    %c0_76 = arith.constant 0 : index
    %c0_77 = arith.constant 0 : index
    %157 = vector.load %arg16[%c1_75, %c0_76, %c0_77] : memref<8x16x128xf32, #tpu.memory_space<vmem>>, vector<1x16x128xf32>
    %158 = vector.shape_cast %157 : vector<1x16x128xf32> to vector<16x128xf32>
    %159 = arith.mulf %158, %153 : vector<16x128xf32>
    %c1_78 = arith.constant 1 : index
    %c0_79 = arith.constant 0 : index
    %c0_80 = arith.constant 0 : index
    %160 = vector.load %arg17[%c1_78, %c0_79, %c0_80] : memref<8x16x128xf32, #tpu.memory_space<vmem>>, vector<1x16x128xf32>
    %161 = vector.shape_cast %160 : vector<1x16x128xf32> to vector<16x128xf32>
    %162 = arith.addf %159, %161 : vector<16x128xf32>
    %c1_81 = arith.constant 1 : index
    %c0_82 = arith.constant 0 : index
    %c0_83 = arith.constant 0 : index
    %163 = vector.load %arg18[%c1_81, %c0_82, %c0_83] : memref<8x16x128xf32, #tpu.memory_space<vmem>>, vector<1x16x128xf32>
    %164 = vector.shape_cast %163 : vector<1x16x128xf32> to vector<16x128xf32>
    %165 = vector.shape_cast %162 : vector<16x128xf32> to vector<1x16x128xf32>
    tpu.vector_store %arg18[%c1_81, %c0_82, %c0_83], %165 {strides = array<i32>} : memref<8x16x128xf32, #tpu.memory_space<vmem>>, vector<1x16x128xf32>,
    %c2 = arith.constant 2 : index
    %c0_84 = arith.constant 0 : index
    %c0_85 = arith.constant 0 : index
    %166 = vector.load %arg16[%c2, %c0_84, %c0_85] : memref<8x16x128xf32, #tpu.memory_space<vmem>>, vector<1x16x128xf32>
    %167 = vector.shape_cast %166 : vector<1x16x128xf32> to vector<16x128xf32>
    %168 = arith.mulf %167, %162 : vector<16x128xf32>
    %c2_86 = arith.constant 2 : index
    %c0_87 = arith.constant 0 : index
    %c0_88 = arith.constant 0 : index
    %169 = vector.load %arg17[%c2_86, %c0_87, %c0_88] : memref<8x16x128xf32, #tpu.memory_space<vmem>>, vector<1x16x128xf32>
    %170 = vector.shape_cast %169 : vector<1x16x128xf32> to vector<16x128xf32>
    %171 = arith.addf %168, %170 : vector<16x128xf32>
    %c2_89 = arith.constant 2 : index
    %c0_90 = arith.constant 0 : index
    %c0_91 = arith.constant 0 : index
    %172 = vector.load %arg18[%c2_89, %c0_90, %c0_91] : memref<8x16x128xf32, #tpu.memory_space<vmem>>, vector<1x16x128xf32>
    %173 = vector.shape_cast %172 : vector<1x16x128xf32> to vector<16x128xf32>
    %174 = vector.shape_cast %171 : vector<16x128xf32> to vector<1x16x128xf32>
    tpu.vector_store %arg18[%c2_89, %c0_90, %c0_91], %174 {strides = array<i32>} : memref<8x16x128xf32, #tpu.memory_space<vmem>>, vector<1x16x128xf32>,
    %c3 = arith.constant 3 : index
    %c0_92 = arith.constant 0 : index
    %c0_93 = arith.constant 0 : index
    %175 = vector.load %arg16[%c3, %c0_92, %c0_93] : memref<8x16x128xf32, #tpu.memory_space<vmem>>, vector<1x16x128xf32>
    %176 = vector.shape_cast %175 : vector<1x16x128xf32> to vector<16x128xf32>
    %177 = arith.mulf %176, %171 : vector<16x128xf32>
    %c3_94 = arith.constant 3 : index
    %c0_95 = arith.constant 0 : index
    %c0_96 = arith.constant 0 : index
    %178 = vector.load %arg17[%c3_94, %c0_95, %c0_96] : memref<8x16x128xf32, #tpu.memory_space<vmem>>, vector<1x16x128xf32>
    %179 = vector.shape_cast %178 : vector<1x16x128xf32> to vector<16x128xf32>
    %180 = arith.addf %177, %179 : vector<16x128xf32>
    %c3_97 = arith.constant 3 : index
    %c0_98 = arith.constant 0 : index
    %c0_99 = arith.constant 0 : index
    %181 = vector.load %arg18[%c3_97, %c0_98, %c0_99] : memref<8x16x128xf32, #tpu.memory_space<vmem>>, vector<1x16x128xf32>
    %182 = vector.shape_cast %181 : vector<1x16x128xf32> to vector<16x128xf32>
    %183 = vector.shape_cast %180 : vector<16x128xf32> to vector<1x16x128xf32>
    tpu.vector_store %arg18[%c3_97, %c0_98, %c0_99], %183 {strides = array<i32>} : memref<8x16x128xf32, #tpu.memory_space<vmem>>, vector<1x16x128xf32>,
    %c4 = arith.constant 4 : index
    %c0_100 = arith.constant 0 : index
    %c0_101 = arith.constant 0 : index
    %184 = vector.load %arg16[%c4, %c0_100, %c0_101] : memref<8x16x128xf32, #tpu.memory_space<vmem>>, vector<1x16x128xf32>
    %185 = vector.shape_cast %184 : vector<1x16x128xf32> to vector<16x128xf32>
    %186 = arith.mulf %185, %180 : vector<16x128xf32>
    %c4_102 = arith.constant 4 : index
    %c0_103 = arith.constant 0 : index
    %c0_104 = arith.constant 0 : index
    %187 = vector.load %arg17[%c4_102, %c0_103, %c0_104] : memref<8x16x128xf32, #tpu.memory_space<vmem>>, vector<1x16x128xf32>
    %188 = vector.shape_cast %187 : vector<1x16x128xf32> to vector<16x128xf32>
    %189 = arith.addf %186, %188 : vector<16x128xf32>
    %c4_105 = arith.constant 4 : index
    %c0_106 = arith.constant 0 : index
    %c0_107 = arith.constant 0 : index
    %190 = vector.load %arg18[%c4_105, %c0_106, %c0_107] : memref<8x16x128xf32, #tpu.memory_space<vmem>>, vector<1x16x128xf32>
    %191 = vector.shape_cast %190 : vector<1x16x128xf32> to vector<16x128xf32>
    %192 = vector.shape_cast %189 : vector<16x128xf32> to vector<1x16x128xf32>
    tpu.vector_store %arg18[%c4_105, %c0_106, %c0_107], %192 {strides = array<i32>} : memref<8x16x128xf32, #tpu.memory_space<vmem>>, vector<1x16x128xf32>,
    %c5_108 = arith.constant 5 : index
    %c0_109 = arith.constant 0 : index
    %c0_110 = arith.constant 0 : index
    %193 = vector.load %arg16[%c5_108, %c0_109, %c0_110] : memref<8x16x128xf32, #tpu.memory_space<vmem>>, vector<1x16x128xf32>
    %194 = vector.shape_cast %193 : vector<1x16x128xf32> to vector<16x128xf32>
    %195 = arith.mulf %194, %189 : vector<16x128xf32>
    %c5_111 = arith.constant 5 : index
    %c0_112 = arith.constant 0 : index
    %c0_113 = arith.constant 0 : index
    %196 = vector.load %arg17[%c5_111, %c0_112, %c0_113] : memref<8x16x128xf32, #tpu.memory_space<vmem>>, vector<1x16x128xf32>
    %197 = vector.shape_cast %196 : vector<1x16x128xf32> to vector<16x128xf32>
    %198 = arith.addf %195, %197 : vector<16x128xf32>
    %c5_114 = arith.constant 5 : index
    %c0_115 = arith.constant 0 : index
    %c0_116 = arith.constant 0 : index
    %199 = vector.load %arg18[%c5_114, %c0_115, %c0_116] : memref<8x16x128xf32, #tpu.memory_space<vmem>>, vector<1x16x128xf32>
    %200 = vector.shape_cast %199 : vector<1x16x128xf32> to vector<16x128xf32>
    %201 = vector.shape_cast %198 : vector<16x128xf32> to vector<1x16x128xf32>
    tpu.vector_store %arg18[%c5_114, %c0_115, %c0_116], %201 {strides = array<i32>} : memref<8x16x128xf32, #tpu.memory_space<vmem>>, vector<1x16x128xf32>,
    %c6 = arith.constant 6 : index
    %c0_117 = arith.constant 0 : index
    %c0_118 = arith.constant 0 : index
    %202 = vector.load %arg16[%c6, %c0_117, %c0_118] : memref<8x16x128xf32, #tpu.memory_space<vmem>>, vector<1x16x128xf32>
    %203 = vector.shape_cast %202 : vector<1x16x128xf32> to vector<16x128xf32>
    %204 = arith.mulf %203, %198 : vector<16x128xf32>
    %c6_119 = arith.constant 6 : index
    %c0_120 = arith.constant 0 : index
    %c0_121 = arith.constant 0 : index
    %205 = vector.load %arg17[%c6_119, %c0_120, %c0_121] : memref<8x16x128xf32, #tpu.memory_space<vmem>>, vector<1x16x128xf32>
    %206 = vector.shape_cast %205 : vector<1x16x128xf32> to vector<16x128xf32>
    %207 = arith.addf %204, %206 : vector<16x128xf32>
    %c6_122 = arith.constant 6 : index
    %c0_123 = arith.constant 0 : index
    %c0_124 = arith.constant 0 : index
    %208 = vector.load %arg18[%c6_122, %c0_123, %c0_124] : memref<8x16x128xf32, #tpu.memory_space<vmem>>, vector<1x16x128xf32>
    %209 = vector.shape_cast %208 : vector<1x16x128xf32> to vector<16x128xf32>
    %210 = vector.shape_cast %207 : vector<16x128xf32> to vector<1x16x128xf32>
    tpu.vector_store %arg18[%c6_122, %c0_123, %c0_124], %210 {strides = array<i32>} : memref<8x16x128xf32, #tpu.memory_space<vmem>>, vector<1x16x128xf32>,
    %c7 = arith.constant 7 : index
    %c0_125 = arith.constant 0 : index
    %c0_126 = arith.constant 0 : index
    %211 = vector.load %arg16[%c7, %c0_125, %c0_126] : memref<8x16x128xf32, #tpu.memory_space<vmem>>, vector<1x16x128xf32>
    %212 = vector.shape_cast %211 : vector<1x16x128xf32> to vector<16x128xf32>
    %213 = arith.mulf %212, %207 : vector<16x128xf32>
    %c7_127 = arith.constant 7 : index
    %c0_128 = arith.constant 0 : index
    %c0_129 = arith.constant 0 : index
    %214 = vector.load %arg17[%c7_127, %c0_128, %c0_129] : memref<8x16x128xf32, #tpu.memory_space<vmem>>, vector<1x16x128xf32>
    %215 = vector.shape_cast %214 : vector<1x16x128xf32> to vector<16x128xf32>
    %216 = arith.addf %213, %215 : vector<16x128xf32>
    %c7_130 = arith.constant 7 : index
    %c0_131 = arith.constant 0 : index
    %c0_132 = arith.constant 0 : index
    %217 = vector.load %arg18[%c7_130, %c0_131, %c0_132] : memref<8x16x128xf32, #tpu.memory_space<vmem>>, vector<1x16x128xf32>
    %218 = vector.shape_cast %217 : vector<1x16x128xf32> to vector<16x128xf32>
    %219 = vector.shape_cast %216 : vector<16x128xf32> to vector<1x16x128xf32>
    tpu.vector_store %arg18[%c7_130, %c0_131, %c0_132], %219 {strides = array<i32>} : memref<8x16x128xf32, #tpu.memory_space<vmem>>, vector<1x16x128xf32>,
    %c0_133 = arith.constant 0 : index
    %c0_134 = arith.constant 0 : index
    %c0_135 = arith.constant 0 : index
    %220 = vector.load %arg18[%c0_133, %c0_134, %c0_135] : memref<8x16x128xf32, #tpu.memory_space<vmem>>, vector<8x16x128xf32>
    %221 = vector.extract_strided_slice %130 {offsets = [0, 16], sizes = [8, 16], strides = [1, 1]} : vector<8x32xf32> to vector<8x16xf32>
    %222 = vector.shape_cast %221 : vector<8x16xf32> to vector<8x16x1xf32>
    %223 = vector.broadcast %222 : vector<8x16x1xf32> to vector<8x16x128xf32>
    %224 = arith.mulf %220, %223 : vector<8x16x128xf32>
    %cst_136 = arith.constant dense<0.000000e+00> : vector<8x128xf32>
    %225 = vector.multi_reduction <add>, %224, %cst_136 [1] : vector<8x16x128xf32> to vector<8x128xf32>
    %226 = arith.index_cast %126 : i32 to index
    %c0_137 = arith.constant 0 : index
    %227 = vector.load %arg19[%226, %c0_137] : memref<16x128xf32, #tpu.memory_space<vmem>>, vector<8x128xf32>
    tpu.vector_store %arg19[%226, %c0_137], %225 {strides = array<i32>} : memref<16x128xf32, #tpu.memory_space<vmem>>, vector<8x128xf32>,
    %c1_i32 = arith.constant 1 : i32
    %c0_138 = arith.constant 0 : index
    %c0_139 = arith.constant 0 : index
    %c0_140 = arith.constant 0 : index
    %228 = vector.load %arg11[%c0_138, %c0_139, %c0_140] : memref<2x16x128xf32, #tpu.memory_space<vmem>>, vector<1x16x128xf32>
    %229 = vector.shape_cast %228 : vector<1x16x128xf32> to vector<16x128xf32>
    %230 = vector.shape_cast %216 : vector<16x128xf32> to vector<1x16x128xf32>
    tpu.vector_store %arg11[%c0_138, %c0_139, %c0_140], %230 {strides = array<i32>} : memref<2x16x128xf32, #tpu.memory_space<vmem>>, vector<1x16x128xf32>,
    %c1_141 = arith.constant 1 : index
    %c0_142 = arith.constant 0 : index
    %c0_143 = arith.constant 0 : index
    %231 = vector.load %arg11[%c1_141, %c0_142, %c0_143] : memref<2x16x128xf32, #tpu.memory_space<vmem>>, vector<1x16x128xf32>
    %232 = vector.shape_cast %231 : vector<1x16x128xf32> to vector<16x128xf32>
    %c0_i32_144 = arith.constant 0 : i32
    %c8_i32_145 = arith.constant 8 : i32
    %233 = arith.muli %c0_i32_144, %c8_i32_145 : i32
    %c8_i32_146 = arith.constant 8 : i32
    %234 = arith.addi %c8_i32_146, %233 : i32
    %235 = tpu.assume_multiple %234, 8 : i32
    %236 = arith.index_cast %235 : i32 to index
    %c0_147 = arith.constant 0 : index
    %237 = vector.load %arg15[%236, %c0_147] : memref<16x256xf32, #tpu.memory_space<vmem>>, vector<8x256xf32>
    %238 = vector.extract_strided_slice %237 {offsets = [0, 0], sizes = [8, 128], strides = [1, 1]} : vector<8x256xf32> to vector<8x128xf32>
    %239 = vector.extract_strided_slice %237 {offsets = [0, 128], sizes = [8, 32], strides = [1, 1]} : vector<8x256xf32> to vector<8x32xf32>
    %240 = arith.index_cast %235 : i32 to index
    %c0_148 = arith.constant 0 : index
    %241 = vector.load %arg13[%240, %c0_148] : memref<16x128xf32, #tpu.memory_space<vmem>>, vector<8x128xf32>
    %242 = vector.shape_cast %238 : vector<8x128xf32> to vector<8x1x128xf32>
    %243 = vector.shape_cast %121 : vector<16x128xf32> to vector<1x16x128xf32>
    %244 = vector.broadcast %242 : vector<8x1x128xf32> to vector<8x16x128xf32>
    %245 = vector.broadcast %243 : vector<1x16x128xf32> to vector<8x16x128xf32>
    %246 = arith.mulf %244, %245 : vector<8x16x128xf32>
    %247 = math.exp %246 : vector<8x16x128xf32>
    %c0_149 = arith.constant 0 : index
    %c0_150 = arith.constant 0 : index
    %c0_151 = arith.constant 0 : index
    %248 = vector.load %arg16[%c0_149, %c0_150, %c0_151] : memref<8x16x128xf32, #tpu.memory_space<vmem>>, vector<8x16x128xf32>
    tpu.vector_store %arg16[%c0_149, %c0_150, %c0_151], %247 {strides = array<i32>} : memref<8x16x128xf32, #tpu.memory_space<vmem>>, vector<8x16x128xf32>,
    %249 = arith.mulf %238, %241 : vector<8x128xf32>
    %250 = vector.shape_cast %249 : vector<8x128xf32> to vector<8x1x128xf32>
    %251 = vector.extract_strided_slice %239 {offsets = [0, 0], sizes = [8, 16], strides = [1, 1]} : vector<8x32xf32> to vector<8x16xf32>
    %252 = vector.shape_cast %251 : vector<8x16xf32> to vector<8x16x1xf32>
    %253 = vector.broadcast %250 : vector<8x1x128xf32> to vector<8x16x128xf32>
    %254 = vector.broadcast %252 : vector<8x16x1xf32> to vector<8x16x128xf32>
    %255 = arith.mulf %253, %254 : vector<8x16x128xf32>
    %c0_152 = arith.constant 0 : index
    %c0_153 = arith.constant 0 : index
    %c0_154 = arith.constant 0 : index
    %256 = vector.load %arg17[%c0_152, %c0_153, %c0_154] : memref<8x16x128xf32, #tpu.memory_space<vmem>>, vector<8x16x128xf32>
    tpu.vector_store %arg17[%c0_152, %c0_153, %c0_154], %255 {strides = array<i32>} : memref<8x16x128xf32, #tpu.memory_space<vmem>>, vector<8x16x128xf32>,
    %c0_155 = arith.constant 0 : index
    %c0_156 = arith.constant 0 : index
    %c0_157 = arith.constant 0 : index
    %257 = vector.load %arg16[%c0_155, %c0_156, %c0_157] : memref<8x16x128xf32, #tpu.memory_space<vmem>>, vector<1x16x128xf32>
    %258 = vector.shape_cast %257 : vector<1x16x128xf32> to vector<16x128xf32>
    %259 = arith.mulf %258, %232 : vector<16x128xf32>
    %c0_158 = arith.constant 0 : index
    %c0_159 = arith.constant 0 : index
    %c0_160 = arith.constant 0 : index
    %260 = vector.load %arg17[%c0_158, %c0_159, %c0_160] : memref<8x16x128xf32, #tpu.memory_space<vmem>>, vector<1x16x128xf32>
    %261 = vector.shape_cast %260 : vector<1x16x128xf32> to vector<16x128xf32>
    %262 = arith.addf %259, %261 : vector<16x128xf32>
    %c0_161 = arith.constant 0 : index
    %c0_162 = arith.constant 0 : index
    %c0_163 = arith.constant 0 : index
    %263 = vector.load %arg18[%c0_161, %c0_162, %c0_163] : memref<8x16x128xf32, #tpu.memory_space<vmem>>, vector<1x16x128xf32>
    %264 = vector.shape_cast %263 : vector<1x16x128xf32> to vector<16x128xf32>
    %265 = vector.shape_cast %262 : vector<16x128xf32> to vector<1x16x128xf32>
    tpu.vector_store %arg18[%c0_161, %c0_162, %c0_163], %265 {strides = array<i32>} : memref<8x16x128xf32, #tpu.memory_space<vmem>>, vector<1x16x128xf32>,
    %c1_164 = arith.constant 1 : index
    %c0_165 = arith.constant 0 : index
    %c0_166 = arith.constant 0 : index
    %266 = vector.load %arg16[%c1_164, %c0_165, %c0_166] : memref<8x16x128xf32, #tpu.memory_space<vmem>>, vector<1x16x128xf32>
    %267 = vector.shape_cast %266 : vector<1x16x128xf32> to vector<16x128xf32>
    %268 = arith.mulf %267, %262 : vector<16x128xf32>
    %c1_167 = arith.constant 1 : index
    %c0_168 = arith.constant 0 : index
    %c0_169 = arith.constant 0 : index
    %269 = vector.load %arg17[%c1_167, %c0_168, %c0_169] : memref<8x16x128xf32, #tpu.memory_space<vmem>>, vector<1x16x128xf32>
    %270 = vector.shape_cast %269 : vector<1x16x128xf32> to vector<16x128xf32>
    %271 = arith.addf %268, %270 : vector<16x128xf32>
    %c1_170 = arith.constant 1 : index
    %c0_171 = arith.constant 0 : index
    %c0_172 = arith.constant 0 : index
    %272 = vector.load %arg18[%c1_170, %c0_171, %c0_172] : memref<8x16x128xf32, #tpu.memory_space<vmem>>, vector<1x16x128xf32>
    %273 = vector.shape_cast %272 : vector<1x16x128xf32> to vector<16x128xf32>
    %274 = vector.shape_cast %271 : vector<16x128xf32> to vector<1x16x128xf32>
    tpu.vector_store %arg18[%c1_170, %c0_171, %c0_172], %274 {strides = array<i32>} : memref<8x16x128xf32, #tpu.memory_space<vmem>>, vector<1x16x128xf32>,
    %c2_173 = arith.constant 2 : index
    %c0_174 = arith.constant 0 : index
    %c0_175 = arith.constant 0 : index
    %275 = vector.load %arg16[%c2_173, %c0_174, %c0_175] : memref<8x16x128xf32, #tpu.memory_space<vmem>>, vector<1x16x128xf32>
    %276 = vector.shape_cast %275 : vector<1x16x128xf32> to vector<16x128xf32>
    %277 = arith.mulf %276, %271 : vector<16x128xf32>
    %c2_176 = arith.constant 2 : index
    %c0_177 = arith.constant 0 : index
    %c0_178 = arith.constant 0 : index
    %278 = vector.load %arg17[%c2_176, %c0_177, %c0_178] : memref<8x16x128xf32, #tpu.memory_space<vmem>>, vector<1x16x128xf32>
    %279 = vector.shape_cast %278 : vector<1x16x128xf32> to vector<16x128xf32>
    %280 = arith.addf %277, %279 : vector<16x128xf32>
    %c2_179 = arith.constant 2 : index
    %c0_180 = arith.constant 0 : index
    %c0_181 = arith.constant 0 : index
    %281 = vector.load %arg18[%c2_179, %c0_180, %c0_181] : memref<8x16x128xf32, #tpu.memory_space<vmem>>, vector<1x16x128xf32>
    %282 = vector.shape_cast %281 : vector<1x16x128xf32> to vector<16x128xf32>
    %283 = vector.shape_cast %280 : vector<16x128xf32> to vector<1x16x128xf32>
    tpu.vector_store %arg18[%c2_179, %c0_180, %c0_181], %283 {strides = array<i32>} : memref<8x16x128xf32, #tpu.memory_space<vmem>>, vector<1x16x128xf32>,
    %c3_182 = arith.constant 3 : index
    %c0_183 = arith.constant 0 : index
    %c0_184 = arith.constant 0 : index
    %284 = vector.load %arg16[%c3_182, %c0_183, %c0_184] : memref<8x16x128xf32, #tpu.memory_space<vmem>>, vector<1x16x128xf32>
    %285 = vector.shape_cast %284 : vector<1x16x128xf32> to vector<16x128xf32>
    %286 = arith.mulf %285, %280 : vector<16x128xf32>
    %c3_185 = arith.constant 3 : index
    %c0_186 = arith.constant 0 : index
    %c0_187 = arith.constant 0 : index
    %287 = vector.load %arg17[%c3_185, %c0_186, %c0_187] : memref<8x16x128xf32, #tpu.memory_space<vmem>>, vector<1x16x128xf32>
    %288 = vector.shape_cast %287 : vector<1x16x128xf32> to vector<16x128xf32>
    %289 = arith.addf %286, %288 : vector<16x128xf32>
    %c3_188 = arith.constant 3 : index
    %c0_189 = arith.constant 0 : index
    %c0_190 = arith.constant 0 : index
    %290 = vector.load %arg18[%c3_188, %c0_189, %c0_190] : memref<8x16x128xf32, #tpu.memory_space<vmem>>, vector<1x16x128xf32>
    %291 = vector.shape_cast %290 : vector<1x16x128xf32> to vector<16x128xf32>
    %292 = vector.shape_cast %289 : vector<16x128xf32> to vector<1x16x128xf32>
    tpu.vector_store %arg18[%c3_188, %c0_189, %c0_190], %292 {strides = array<i32>} : memref<8x16x128xf32, #tpu.memory_space<vmem>>, vector<1x16x128xf32>,
    %c4_191 = arith.constant 4 : index
    %c0_192 = arith.constant 0 : index
    %c0_193 = arith.constant 0 : index
    %293 = vector.load %arg16[%c4_191, %c0_192, %c0_193] : memref<8x16x128xf32, #tpu.memory_space<vmem>>, vector<1x16x128xf32>
    %294 = vector.shape_cast %293 : vector<1x16x128xf32> to vector<16x128xf32>
    %295 = arith.mulf %294, %289 : vector<16x128xf32>
    %c4_194 = arith.constant 4 : index
    %c0_195 = arith.constant 0 : index
    %c0_196 = arith.constant 0 : index
    %296 = vector.load %arg17[%c4_194, %c0_195, %c0_196] : memref<8x16x128xf32, #tpu.memory_space<vmem>>, vector<1x16x128xf32>
    %297 = vector.shape_cast %296 : vector<1x16x128xf32> to vector<16x128xf32>
    %298 = arith.addf %295, %297 : vector<16x128xf32>
    %c4_197 = arith.constant 4 : index
    %c0_198 = arith.constant 0 : index
    %c0_199 = arith.constant 0 : index
    %299 = vector.load %arg18[%c4_197, %c0_198, %c0_199] : memref<8x16x128xf32, #tpu.memory_space<vmem>>, vector<1x16x128xf32>
    %300 = vector.shape_cast %299 : vector<1x16x128xf32> to vector<16x128xf32>
    %301 = vector.shape_cast %298 : vector<16x128xf32> to vector<1x16x128xf32>
    tpu.vector_store %arg18[%c4_197, %c0_198, %c0_199], %301 {strides = array<i32>} : memref<8x16x128xf32, #tpu.memory_space<vmem>>, vector<1x16x128xf32>,
    %c5_200 = arith.constant 5 : index
    %c0_201 = arith.constant 0 : index
    %c0_202 = arith.constant 0 : index
    %302 = vector.load %arg16[%c5_200, %c0_201, %c0_202] : memref<8x16x128xf32, #tpu.memory_space<vmem>>, vector<1x16x128xf32>
    %303 = vector.shape_cast %302 : vector<1x16x128xf32> to vector<16x128xf32>
    %304 = arith.mulf %303, %298 : vector<16x128xf32>
    %c5_203 = arith.constant 5 : index
    %c0_204 = arith.constant 0 : index
    %c0_205 = arith.constant 0 : index
    %305 = vector.load %arg17[%c5_203, %c0_204, %c0_205] : memref<8x16x128xf32, #tpu.memory_space<vmem>>, vector<1x16x128xf32>
    %306 = vector.shape_cast %305 : vector<1x16x128xf32> to vector<16x128xf32>
    %307 = arith.addf %304, %306 : vector<16x128xf32>
    %c5_206 = arith.constant 5 : index
    %c0_207 = arith.constant 0 : index
    %c0_208 = arith.constant 0 : index
    %308 = vector.load %arg18[%c5_206, %c0_207, %c0_208] : memref<8x16x128xf32, #tpu.memory_space<vmem>>, vector<1x16x128xf32>
    %309 = vector.shape_cast %308 : vector<1x16x128xf32> to vector<16x128xf32>
    %310 = vector.shape_cast %307 : vector<16x128xf32> to vector<1x16x128xf32>
    tpu.vector_store %arg18[%c5_206, %c0_207, %c0_208], %310 {strides = array<i32>} : memref<8x16x128xf32, #tpu.memory_space<vmem>>, vector<1x16x128xf32>,
    %c6_209 = arith.constant 6 : index
    %c0_210 = arith.constant 0 : index
    %c0_211 = arith.constant 0 : index
    %311 = vector.load %arg16[%c6_209, %c0_210, %c0_211] : memref<8x16x128xf32, #tpu.memory_space<vmem>>, vector<1x16x128xf32>
    %312 = vector.shape_cast %311 : vector<1x16x128xf32> to vector<16x128xf32>
    %313 = arith.mulf %312, %307 : vector<16x128xf32>
    %c6_212 = arith.constant 6 : index
    %c0_213 = arith.constant 0 : index
    %c0_214 = arith.constant 0 : index
    %314 = vector.load %arg17[%c6_212, %c0_213, %c0_214] : memref<8x16x128xf32, #tpu.memory_space<vmem>>, vector<1x16x128xf32>
    %315 = vector.shape_cast %314 : vector<1x16x128xf32> to vector<16x128xf32>
    %316 = arith.addf %313, %315 : vector<16x128xf32>
    %c6_215 = arith.constant 6 : index
    %c0_216 = arith.constant 0 : index
    %c0_217 = arith.constant 0 : index
    %317 = vector.load %arg18[%c6_215, %c0_216, %c0_217] : memref<8x16x128xf32, #tpu.memory_space<vmem>>, vector<1x16x128xf32>
    %318 = vector.shape_cast %317 : vector<1x16x128xf32> to vector<16x128xf32>
    %319 = vector.shape_cast %316 : vector<16x128xf32> to vector<1x16x128xf32>
    tpu.vector_store %arg18[%c6_215, %c0_216, %c0_217], %319 {strides = array<i32>} : memref<8x16x128xf32, #tpu.memory_space<vmem>>, vector<1x16x128xf32>,
    %c7_218 = arith.constant 7 : index
    %c0_219 = arith.constant 0 : index
    %c0_220 = arith.constant 0 : index
    %320 = vector.load %arg16[%c7_218, %c0_219, %c0_220] : memref<8x16x128xf32, #tpu.memory_space<vmem>>, vector<1x16x128xf32>
    %321 = vector.shape_cast %320 : vector<1x16x128xf32> to vector<16x128xf32>
    %322 = arith.mulf %321, %316 : vector<16x128xf32>
    %c7_221 = arith.constant 7 : index
    %c0_222 = arith.constant 0 : index
    %c0_223 = arith.constant 0 : index
    %323 = vector.load %arg17[%c7_221, %c0_222, %c0_223] : memref<8x16x128xf32, #tpu.memory_space<vmem>>, vector<1x16x128xf32>
    %324 = vector.shape_cast %323 : vector<1x16x128xf32> to vector<16x128xf32>
    %325 = arith.addf %322, %324 : vector<16x128xf32>
    %c7_224 = arith.constant 7 : index
    %c0_225 = arith.constant 0 : index
    %c0_226 = arith.constant 0 : index
    %326 = vector.load %arg18[%c7_224, %c0_225, %c0_226] : memref<8x16x128xf32, #tpu.memory_space<vmem>>, vector<1x16x128xf32>
    %327 = vector.shape_cast %326 : vector<1x16x128xf32> to vector<16x128xf32>
    %328 = vector.shape_cast %325 : vector<16x128xf32> to vector<1x16x128xf32>
    tpu.vector_store %arg18[%c7_224, %c0_225, %c0_226], %328 {strides = array<i32>} : memref<8x16x128xf32, #tpu.memory_space<vmem>>, vector<1x16x128xf32>,
    %c0_227 = arith.constant 0 : index
    %c0_228 = arith.constant 0 : index
    %c0_229 = arith.constant 0 : index
    %329 = vector.load %arg18[%c0_227, %c0_228, %c0_229] : memref<8x16x128xf32, #tpu.memory_space<vmem>>, vector<8x16x128xf32>
    %330 = vector.extract_strided_slice %239 {offsets = [0, 16], sizes = [8, 16], strides = [1, 1]} : vector<8x32xf32> to vector<8x16xf32>
    %331 = vector.shape_cast %330 : vector<8x16xf32> to vector<8x16x1xf32>
    %332 = vector.broadcast %331 : vector<8x16x1xf32> to vector<8x16x128xf32>
    %333 = arith.mulf %329, %332 : vector<8x16x128xf32>
    %cst_230 = arith.constant dense<0.000000e+00> : vector<8x128xf32>
    %334 = vector.multi_reduction <add>, %333, %cst_230 [1] : vector<8x16x128xf32> to vector<8x128xf32>
    %335 = arith.index_cast %235 : i32 to index
    %c0_231 = arith.constant 0 : index
    %336 = vector.load %arg19[%335, %c0_231] : memref<16x128xf32, #tpu.memory_space<vmem>>, vector<8x128xf32>
    tpu.vector_store %arg19[%335, %c0_231], %334 {strides = array<i32>} : memref<16x128xf32, #tpu.memory_space<vmem>>, vector<8x128xf32>,
    %c1_i32_232 = arith.constant 1 : i32
    %c1_233 = arith.constant 1 : index
    %c0_234 = arith.constant 0 : index
    %c0_235 = arith.constant 0 : index
    %337 = vector.load %arg11[%c1_233, %c0_234, %c0_235] : memref<2x16x128xf32, #tpu.memory_space<vmem>>, vector<1x16x128xf32>
    %338 = vector.shape_cast %337 : vector<1x16x128xf32> to vector<16x128xf32>
    %339 = vector.shape_cast %325 : vector<16x128xf32> to vector<1x16x128xf32>
    tpu.vector_store %arg11[%c1_233, %c0_234, %c0_235], %339 {strides = array<i32>} : memref<2x16x128xf32, #tpu.memory_space<vmem>>, vector<1x16x128xf32>,
    %c0_236 = arith.constant 0 : index
    %c0_237 = arith.constant 0 : index
    %340 = vector.load %arg19[%c0_236, %c0_237] : memref<16x128xf32, #tpu.memory_space<vmem>>, vector<16x128xf32>
    %c0_238 = arith.constant 0 : index
    %c0_239 = arith.constant 0 : index
    %341 = vector.load %arg13[%c0_238, %c0_239] : memref<16x128xf32, #tpu.memory_space<vmem>>, vector<16x128xf32>
    %cst_240 = arith.constant 1.280000e+02 : f32
    %342 = vector.broadcast %cst_240 : f32 to vector<16x128xf32>
    %343 = arith.mulf %341, %342 : vector<16x128xf32>
    %344 = arith.addf %340, %343 : vector<16x128xf32>
    %c0_241 = arith.constant 0 : index
    %c0_242 = arith.constant 0 : index
    %345 = vector.load %arg14[%c0_241, %c0_242] : memref<16x128xf32, #tpu.memory_space<vmem>>, vector<16x128xf32>
    %346 = arith.mulf %344, %345 : vector<16x128xf32>
    %347 = arith.truncf %346 : vector<16x128xf32> to vector<16x128xbf16>
    %c0_243 = arith.constant 0 : index
    %c0_244 = arith.constant 0 : index
    %348 = vector.load %arg9[%c0_243, %c0_244] : memref<128x64xbf16, #tpu.memory_space<vmem>>, vector<128x64xbf16>
    %cst_245 = arith.constant dense<0.000000e+00> : vector<16x64xf32>
    %349 = tpu.matmul %347, %348, %cst_245 {dimension_numbers = #tpu.dot_dimension_numbers<[1], [0], [0], [1], [0, 0, 1, 1], [], []>} : vector<16x128xbf16>, vector<128x64xbf16>, vector<16x64xf32> -> vector<16x64xf32>
    %350 = vector.shape_cast %349 : vector<16x64xf32> to vector<2x8x64xf32>
    %c0_246 = arith.constant 0 : index
    %c0_247 = arith.constant 0 : index
    %c0_248 = arith.constant 0 : index
    %351 = vector.load %arg10[%c0_246, %c0_247, %c0_248] : memref<2x8x64xf32, #tpu.memory_space<vmem>>, vector<2x8x64xf32>
    tpu.vector_store %arg10[%c0_246, %c0_247, %c0_248], %350 {strides = array<i32>} : memref<2x8x64xf32, #tpu.memory_space<vmem>>, vector<2x8x64xf32>,
    return
  }
  func.func @transform_0(%arg0: i32, %arg1: i32) -> (i32, i32, i32) {
    %c0_i32 = arith.constant 0 : i32
    %c0_i32_0 = arith.constant 0 : i32
    return %arg0, %arg1, %c0_i32 : i32, i32, i32
  }
  func.func @transform_1(%arg0: i32, %arg1: i32) -> (i32, i32) {
    %c0_i32 = arith.constant 0 : i32
    %c0_i32_0 = arith.constant 0 : i32
    %c0_i32_1 = arith.constant 0 : i32
    return %c0_i32, %c0_i32_0 : i32, i32
  }
  func.func @transform_2(%arg0: i32, %arg1: i32) -> (i32, i32) {
    %c0_i32 = arith.constant 0 : i32
    %c0_i32_0 = arith.constant 0 : i32
    %c0_i32_1 = arith.constant 0 : i32
    return %c0_i32, %c0_i32_0 : i32, i32
  }
  func.func @transform_3(%arg0: i32, %arg1: i32) -> (i32, i32) {
    %c0_i32 = arith.constant 0 : i32
    %c0_i32_0 = arith.constant 0 : i32
    %c0_i32_1 = arith.constant 0 : i32
    return %c0_i32, %c0_i32_0 : i32, i32
  }
  func.func @transform_4(%arg0: i32, %arg1: i32) -> (i32, i32) {
    %c0_i32 = arith.constant 0 : i32
    %c0_i32_0 = arith.constant 0 : i32
    %c0_i32_1 = arith.constant 0 : i32
    return %c0_i32, %c0_i32_0 : i32, i32
  }
  func.func @transform_5(%arg0: i32, %arg1: i32) -> (i32, i32) {
    %c0_i32 = arith.constant 0 : i32
    %c0_i32_0 = arith.constant 0 : i32
    %c0_i32_1 = arith.constant 0 : i32
    return %c0_i32, %c0_i32_0 : i32, i32
  }
  func.func @transform_6(%arg0: i32, %arg1: i32) -> (i32, i32) {
    %c0_i32 = arith.constant 0 : i32
    %c0_i32_0 = arith.constant 0 : i32
    %c0_i32_1 = arith.constant 0 : i32
    return %c0_i32, %c0_i32_0 : i32, i32
  }
  func.func @transform_7(%arg0: i32, %arg1: i32) -> (i32, i32) {
    %c0_i32 = arith.constant 0 : i32
    %c0_i32_0 = arith.constant 0 : i32
    %c0_i32_1 = arith.constant 0 : i32
    return %c0_i32, %c0_i32_0 : i32, i32
  }
  func.func @transform_8(%arg0: i32, %arg1: i32) -> (i32, i32, i32) {
    %c0_i32 = arith.constant 0 : i32
    %c0_i32_0 = arith.constant 0 : i32
    return %arg0, %arg1, %c0_i32 : i32, i32, i32
  }
}

</mosaic_0001>

<bundles_post_ra>
// kernel: tpu_custom_call.1
= control target key start
LH: loop header
LB: loop body
LE: loop exit
PB: predicated region body
PF: predicated region fallthrough
CT: control target
= control target key end

     0   :  { %13 = vsyncpa [#allocation12], 0  ;;  %s3011_s0 = inlined_call_operand.hbm [shape: f32[2,8,64], index: 0, kind: input, shape index: {}]   ;;  %s3012_s1 = inlined_call_operand.hbm [shape: bf16[64,256], index: 1, kind: input, shape index: {}]   ;;  %s3013_s2 = inlined_call_operand.hbm [shape: f32[4,128], index: 2, kind: input, shape index: {}]   ;;  %s3014_s3 = inlined_call_operand.hbm [shape: f32[1,128], index: 3, kind: input, shape index: {}]   ;;  %s3015_s4 = inlined_call_operand.hbm [shape: f32[128,256], index: 4, kind: input, shape index: {}]   ;;  %s3016_s5 = inlined_call_operand.hbm [shape: f32[1,128], index: 5, kind: input, shape index: {}]   ;;  %s3017_s6 = inlined_call_operand.hbm [shape: f32[16,128], index: 6, kind: input, shape index: {}]   ;;  %s3018_s7 = inlined_call_operand.hbm [shape: bf16[128,64], index: 7, kind: input, shape index: {}]   ;;  %s3019_s8 = inlined_call_operand.hbm [shape: f32[2,8,64], index: 8, kind: output, shape index: {}]  }
   0x1   :  { %14 = vsyncpa [#allocation15], 0 }
   0x2   :  { %15 = vsyncpa [#allocation18], 0 }
   0x3   :  { %16 = vsyncpa [#allocation21], 0 }
   0x4   :  { %17 = vsyncpa [#allocation24], 0 }
   0x5   :  { %18 = vsyncpa [#allocation13], 0  ;;  %s2393_s27 = smov [#allocation14]   ;;  %s2394_s29 = smov [#allocation17]  }
   0x6   :  { %s36_s28 = sshll.u32 %s2393_s27, 4  ;;  %s59_s30 = sshll.u32 %s2394_s29, 4  ;;  %s37_s28 = int_to_ptr.vmem [resolvable:$true] %s36_s28  ;;  %s2457_s30 = int_to_ptr.vmem [resolvable:$true] %s59_s30 }
   0x7   :  { %s2183_s11 = scalar_lea.hbm %s3012_s1, 1024 }
   0x8   :  { %p2184_p0 = scmp.ne.s32.totalorder %s3012_s1, %s2183_s11  ;;  %p2187_p1 = scmp.lt.u32.totalorder %s2183_s11, %s3012_s1 }
   0xa   :  { %p2189_p2 = pnand %p2187_p1, %p2184_p0 }
   0xc   :  { %2192 = shalt.err (!%p2189_p2)
}
   0xd   :  { %s2193_s16 = scalar_lea.vmem %s37_s28, 1024  ;;  %p2198_p4 = scmp.lt.s32.totalorder %s37_s28, %s37_s28 }
   0xe   :  { %p2194_p3 = scmp.ne.s32.totalorder %s37_s28, %s2193_s16  ;;  %p2199_p5 = scmp.lt.s32.totalorder %s2193_s16, %s2193_s16 }
  0x10   :  { %p2200_p6 = por %p2199_p5, %p2198_p4 }
  0x12   :  { %p2201_p7 = pnand %p2200_p6, %p2194_p3 }
  0x14   :  { %2204 = shalt.err (!%p2201_p7)
}
  0x15   :  { %s2395_s17 = smov 128   ;;  %s2396_s18 = smov 8  }
  0x16   :  { %42 = dma.hbm_to_vmem [thread:$0]  %s3012_s1, 1024, %s37_s28, [#allocation15], %s2395_s17, %s2395_s17, %s2396_s18  }
  0x17   :  { %s2205_s23 = scalar_lea.hbm %s3014_s3, 16 }
  0x18   :  { %p2206_p8 = scmp.ne.s32.totalorder %s3014_s3, %s2205_s23  ;;  %p2209_p9 = scmp.lt.u32.totalorder %s2205_s23, %s3014_s3 }
  0x1a   :  { %p2211_p10 = pnand %p2209_p9, %p2206_p8 }
  0x1c   :  { %2214 = shalt.err (!%p2211_p10)
}
  0x1d   :  { %s2215_s29 = scalar_lea.vmem %s2457_s30, 16  ;;  %s2219_s1 = scalar_lea.vmem %s2457_s30, 32 }
  0x1e   :  { %p2216_p11 = scmp.ne.s32.totalorder %s2457_s30, %s2215_s29  ;;  %p2220_p12 = scmp.lt.s32.totalorder %s2457_s30, %s2457_s30 }
  0x1f   :  { %p2221_p13 = scmp.lt.s32.totalorder %s2219_s1, %s2215_s29 }
  0x21   :  { %p2222_p0 = por %p2221_p13, %p2220_p12 }
  0x23   :  { %p2223_p1 = pnand %p2222_p0, %p2216_p11 }
  0x25   :  { %2226 = shalt.err (!%p2223_p1)
}
  0x26   :  { %62 = dma.hbm_to_vmem [thread:$0]  %s3014_s3, 16, %s2457_s30, [#allocation18]  }
  0x27   :  { %s2397_s10 = smov [#allocation20]   ;;  %s2398_s12 = smov [#allocation11]  }
  0x28   :  { %s81_s11 = sshll.u32 %s2397_s10, 4  ;;  %s24_s13 = sshll.u32 %s2398_s12, 4  ;;  %s82_s11 = int_to_ptr.vmem [resolvable:$true] %s81_s11  ;;  %s2492_s13 = int_to_ptr.vmem [resolvable:$true] %s24_s13 }
  0x29   :  { %s2227_s16 = scalar_lea.hbm %s3016_s5, 16 }
  0x2a   :  { %p2228_p2 = scmp.ne.s32.totalorder %s3016_s5, %s2227_s16  ;;  %p2231_p3 = scmp.lt.u32.totalorder %s2227_s16, %s3016_s5 }
  0x2c   :  { %p2233_p4 = pnand %p2231_p3, %p2228_p2 }
  0x2e   :  { %2236 = shalt.err (!%p2233_p4)
}
  0x2f   :  { %s2237_s3 = scalar_lea.vmem %s82_s11, 16  ;;  %s2241_s30 = scalar_lea.vmem %s82_s11, 32 }
  0x30   :  { %p2238_p5 = scmp.ne.s32.totalorder %s82_s11, %s2237_s3  ;;  %p2242_p6 = scmp.lt.s32.totalorder %s82_s11, %s82_s11 }
  0x31   :  { %p2243_p7 = scmp.lt.s32.totalorder %s2241_s30, %s2237_s3 }
  0x33   :  { %p2244_p8 = por %p2243_p7, %p2242_p6 }
  0x35   :  { %p2245_p9 = pnand %p2244_p8, %p2238_p5 }
  0x37   :  { %2248 = shalt.err (!%p2245_p9)
}
  0x38   :  { %84 = dma.hbm_to_vmem [thread:$0]  %s3016_s5, 16, %s82_s11, [#allocation21]  }
  0x39   :  { %s2249_s27 = scalar_lea.hbm %s3011_s0, 256 }
  0x3a   :  { %p2250_p10 = scmp.ne.s32.totalorder %s3011_s0, %s2249_s27  ;;  %p2253_p11 = scmp.lt.u32.totalorder %s2249_s27, %s3011_s0 }
  0x3c   :  { %p2255_p12 = pnand %p2253_p11, %p2250_p10 }
  0x3e   :  { %2258 = shalt.err (!%p2255_p12)
}
  0x3f   :  { %s2259_s10 = scalar_lea.vmem %s2492_s13, 256  ;;  %p2264_p0 = scmp.lt.s32.totalorder %s2492_s13, %s2492_s13 }
  0x40   :  { %p2260_p13 = scmp.ne.s32.totalorder %s2492_s13, %s2259_s10  ;;  %p2265_p1 = scmp.lt.s32.totalorder %s2259_s10, %s2259_s10 }
  0x42   :  { %p2266_p2 = por %p2265_p1, %p2264_p0 }
  0x44   :  { %p2267_p3 = pnand %p2266_p2, %p2260_p13 }
  0x46   :  { %2270 = shalt.err (!%p2267_p3)
}
  0x47   :  { %30 = dma.hbm_to_vmem [thread:$0]  %s3011_s0, 256, %s2492_s13, [#allocation12], %s2395_s17, %s2395_s17, %s2396_s18  }
  0x48   :  { %s2399_s12 = smov [#allocation16]   ;;  %s2400_s15 = smov [#allocation19]  }
  0x49   :  { %s49_s14 = sshll.u32 %s2399_s12, 4  ;;  %s68_s16 = sshll.u32 %s2400_s15, 4  ;;  %s50_s14 = int_to_ptr.vmem [resolvable:$true] %s49_s14  ;;  %s2526_s16 = int_to_ptr.vmem [resolvable:$true] %s68_s16 }
  0x4a   :  { %s2271_s21 = scalar_lea.hbm %s3013_s2, 64 }
  0x4b   :  { %p2272_p4 = scmp.ne.s32.totalorder %s3013_s2, %s2271_s21  ;;  %p2275_p5 = scmp.lt.u32.totalorder %s2271_s21, %s3013_s2 }
  0x4d   :  { %p2277_p6 = pnand %p2275_p5, %p2272_p4 }
  0x4f   :  { %2280 = shalt.err (!%p2277_p6)
}
  0x50   :  { %s2281_s0 = scalar_lea.vmem %s50_s14, 64  ;;  %p2286_p8 = scmp.lt.s32.totalorder %s50_s14, %s50_s14 }
  0x51   :  { %p2282_p7 = scmp.ne.s32.totalorder %s50_s14, %s2281_s0  ;;  %p2287_p9 = scmp.lt.s32.totalorder %s2281_s0, %s2281_s0 }
  0x53   :  { %p2288_p10 = por %p2287_p9, %p2286_p8 }
  0x55   :  { %p2289_p11 = pnand %p2288_p10, %p2282_p7 }
  0x57   :  { %2292 = shalt.err (!%p2289_p11)
}
  0x58   :  { %52 = dma.hbm_to_vmem [thread:$0]  %s3013_s2, 64, %s50_s14, [#allocation15]  }
  0x59   :  { %s2293_s27 = scalar_lea.hbm %s3015_s4, 4096 }
  0x5a   :  { %p2294_p12 = scmp.ne.s32.totalorder %s3015_s4, %s2293_s27  ;;  %p2297_p13 = scmp.lt.u32.totalorder %s2293_s27, %s3015_s4 }
  0x5c   :  { %p2299_p0 = pnand %p2297_p13, %p2294_p12 }
  0x5e   :  { %2302 = shalt.err (!%p2299_p0)
}
  0x5f   :  { %s2303_s10 = scalar_lea.vmem %s2526_s16, 4096  ;;  %p2308_p2 = scmp.lt.s32.totalorder %s2526_s16, %s2526_s16 }
  0x60   :  { %p2304_p1 = scmp.ne.s32.totalorder %s2526_s16, %s2303_s10  ;;  %p2309_p3 = scmp.lt.s32.totalorder %s2303_s10, %s2303_s10 }
  0x62   :  { %p2310_p4 = por %p2309_p3, %p2308_p2 }
  0x64   :  { %p2311_p5 = pnand %p2310_p4, %p2304_p1 }
  0x66   :  { %2314 = shalt.err (!%p2311_p5)
}
  0x67   :  { %s2401_s2 = smov 256   ;;  %s2402_s5 = smov 16  }
  0x68   :  { %74 = dma.hbm_to_vmem [thread:$0]  %s3015_s4, 4096, %s2526_s16, [#allocation18], %s2401_s2, %s2401_s2, %s2402_s5  }
  0x69   :  { %s2403_s14 = smov [#allocation22]   ;;  %s2404_s19 = smov [#allocation23]  }
  0x6a   :  { %s90_s15 = sshll.u32 %s2403_s14, 4  ;;  %s102_s20 = sshll.u32 %s2404_s19, 4  ;;  %s91_s15 = int_to_ptr.vmem [resolvable:$true] %s90_s15  ;;  %s2557_s20 = int_to_ptr.vmem [resolvable:$true] %s102_s20 }
  0x6b   :  { %s2315_s3 = scalar_lea.hbm %s3017_s6, 256 }
  0x6c   :  { %p2316_p6 = scmp.ne.s32.totalorder %s3017_s6, %s2315_s3  ;;  %p2319_p7 = scmp.lt.u32.totalorder %s2315_s3, %s3017_s6 }
  0x6e   :  { %p2321_p8 = pnand %p2319_p7, %p2316_p6 }
  0x70   :  { %2324 = shalt.err (!%p2321_p8)
}
  0x71   :  { %s2325_s4 = scalar_lea.vmem %s91_s15, 256  ;;  %p2330_p10 = scmp.lt.s32.totalorder %s91_s15, %s91_s15 }
  0x72   :  { %p2326_p9 = scmp.ne.s32.totalorder %s91_s15, %s2325_s4  ;;  %p2331_p11 = scmp.lt.s32.totalorder %s2325_s4, %s2325_s4 }
  0x74   :  { %p2332_p12 = por %p2331_p11, %p2330_p10 }
  0x76   :  { %p2333_p13 = pnand %p2332_p12, %p2326_p9 }
  0x78   :  { %2336 = shalt.err (!%p2333_p13)
}
  0x79   :  { %96 = dma.hbm_to_vmem [thread:$0]  %s3017_s6, 256, %s91_s15, [#allocation21], %s2395_s17, %s2395_s17, %s2396_s18  }
  0x7a   :  { %s2337_s27 = scalar_lea.hbm %s3018_s7, 1024 }
  0x7b   :  { %p2338_p0 = scmp.ne.s32.totalorder %s3018_s7, %s2337_s27  ;;  %p2341_p1 = scmp.lt.u32.totalorder %s2337_s27, %s3018_s7 }
  0x7d   :  { %p2343_p2 = pnand %p2341_p1, %p2338_p0 }
  0x7f   :  { %2346 = shalt.err (!%p2343_p2)
}
  0x80   :  { %s2347_s10 = scalar_lea.vmem %s2557_s20, 1024  ;;  %p2352_p4 = scmp.lt.s32.totalorder %s2557_s20, %s2557_s20 }
  0x81   :  { %p2348_p3 = scmp.ne.s32.totalorder %s2557_s20, %s2347_s10  ;;  %p2353_p5 = scmp.lt.s32.totalorder %s2347_s10, %s2347_s10 }
  0x83   :  { %p2354_p6 = por %p2353_p5, %p2352_p4 }
  0x85   :  { %p2355_p7 = pnand %p2354_p6, %p2348_p3 }
  0x87   :  { %2358 = shalt.err (!%p2355_p7)
}
  0x88   :  { %s2405_s6 = smov 64   ;;  %s2406_s2 = smov 4  }
  0x89   :  { %108 = dma.hbm_to_vmem [thread:$0]  %s3018_s7, 1024, %s2557_s20, [#allocation24], %s2405_s6, %s2405_s6, %s2406_s2  }
  0x8a   :  { %2381 = dma.done.wait [#allocation12], 256  }
  0x8b   :  { %2382 = vsyncadd [#allocation12], 4294967040 }
  0x8c   :  { %2383 = dma.done.wait [#allocation15], 1088  }
  0x8d   :  { %2384 = vsyncadd [#allocation15], 4294966208 }
  0x8e   :  { %2385 = dma.done.wait [#allocation18], 4112  }
  0x8f   :  { %2386 = vsyncadd [#allocation18], 4294963184 }
  0x90   :  { %2387 = dma.done.wait [#allocation21], 272  }
  0x91   :  { %2388 = vsyncadd [#allocation21], 4294967024 }
  0x92   :  { %2389 = dma.done.wait [#allocation24], 1024  }
  0x93   :  { %2390 = vsyncadd [#allocation24], 4294966272  ;;  %v2407_v0 = vmov 0   ;;  %v2408_v1 = vmov 0.0   ;;  %v2067_v2 = vld [vmem:[#allocation14 + $0x4] ss:$8 sps:$4 sm:$0xff]   ;;  %v271_v61 = vlaneseq }
  0x94   :  { %233 = vmatprep.mubr.bf16.mxu0 %v2407_v0  ;;  %489 = vmatprep.mubr.f32.mxu1 %v2408_v1  ;;  %v2069_v3 = vld [vmem:[#allocation14] ss:$8 sps:$4 sm:$0xff]   ;;  %v2070_v4 = vld [vmem:[#allocation14 + $0x14] ss:$8 sps:$4 sm:$0xff]   ;;  %v2072_v5 = vld [vmem:[#allocation14 + $0x10] ss:$8 sps:$4 sm:$0xff]  }
  0x95   :  { %201 = vmatprep.subr.bf16.mxu0 %v2067_v2  ;;  %v2073_v6 = vld [vmem:[#allocation14 + $0x24] ss:$8 sps:$4 sm:$0xff]   ;;  %v2075_v7 = vld [vmem:[#allocation14 + $0x20] ss:$8 sps:$4 sm:$0xff]   ;;  %v2076_v8 = vld [vmem:[#allocation14 + $0x34] ss:$8 sps:$4 sm:$0xff]  }
  0x96   :  { %202 = vmatpush1.bf16.msra.mxu0 %v2069_v3  ;;  %v2078_v9 = vld [vmem:[#allocation14 + $0x30] ss:$8 sps:$4 sm:$0xff]   ;;  %vm197_vm0 = vcmask 523264   ;;  %v396_v14 = vld [vmem:[#allocation19 + $0x18] sm:$0xff]  ;;  %v393_v16 = vld [vmem:[#allocation19] sm:$0xff]  ;;  %v2594_v62 = vshrl.u32 %v271_v61, 7 }
  0x97   :  { %203 = vmatprep.subr.bf16.mxu0 %v2070_v4  ;;  %v146_v10 = vld [vmem:[#allocation11] sm:$0xff]  ;;  %v147_v11 = vld [vmem:[#allocation11 + $0x8] sm:$0xff]  ;;  %v397_v22 = vld [vmem:[#allocation19 + $0x20] sm:$0xff]  ;;  %vm287_vm1 = vcmask 1046528   ;;  %vm303_vm2 = vcmask 1045504   ;;  %vm2410_vm4 = vmmov 0  }
  0x98   :  { %v148_v12 = vpack.c.bf16 %v147_v11, %v146_v10  ;;  %v394_v13 = vld [vmem:[#allocation19 + $0x8] sm:$0xff]  ;;  %v395_v17 = vld [vmem:[#allocation19 + $0x10] sm:$0xff]  ;;  %v400_v20 = vld [vmem:[#allocation19 + $0x38] sm:$0xff]  ;;  %v2597_v63 = vsub.s32 1, %v2594_v62  ;;  %v2600_v0 = vsub.s32 2, %v2594_v62  ;;  %v2603_v3 = vsub.s32 0, %v2594_v62 }
  0x99   :  { %v2016_v15 = vpack.c.bf16 %v396_v14, %v394_v13  ;;  %v2018_v18 = vpack.c.bf16 %v395_v17, %v393_v16  ;;  %v398_v19 = vld [vmem:[#allocation19 + $0x28] sm:$0xff]  ;;  %v399_v23 = vld [vmem:[#allocation19 + $0x30] sm:$0xff]  ;;  %v404_v26 = vld [vmem:[#allocation19 + $0x58] sm:$0xff]  ;;  %vm1181_vm6 = vcmask 1041409   ;;  %vm1183_vm7 = vcmask 1042434   ;;  %s2411_s7 = smov [#allocation25]  }
  0x9a   :  { %204 = vmatpush1.bf16.msra.mxu0 %v2072_v5  ;;  %v2020_v21 = vpack.c.bf16 %v400_v20, %v398_v19  ;;  %v2022_v24 = vpack.c.bf16 %v399_v23, %v397_v22  ;;  %v402_v25 = vld [vmem:[#allocation19 + $0x48] sm:$0xff]  ;;  %v401_v28 = vld [vmem:[#allocation19 + $0x40] sm:$0xff]  ;;  %v403_v29 = vld [vmem:[#allocation19 + $0x50] sm:$0xff]  ;;  %vm1185_vm8 = vcmask 1043459   ;;  %vm1187_vm9 = vcmask 1044484   ;;  %s1951_s12 = sshll.u32 %s2411_s7, 4  ;;  %s1952_s12 = int_to_ptr.vmem [resolvable:$true] %s1951_s12 }
  0x9b   :  { %205 = vmatprep.subr.bf16.mxu0 %v2073_v6  ;;  %2017 = vmatprep.subr.bf16.mxu1 %v2016_v15  ;;  %v2024_v27 = vpack.c.bf16 %v404_v26, %v402_v25  ;;  %v2026_v30 = vpack.c.bf16 %v403_v29, %v401_v28  ;;  %v406_v31 = vld [vmem:[#allocation19 + $0x68] sm:$0xff]  ;;  %v408_v32 = vld [vmem:[#allocation19 + $0x78] sm:$0xff]  ;;  %v405_v34 = vld [vmem:[#allocation19 + $0x60] sm:$0xff]  ;;  %vm1189_vm10 = vcmask 1045509   ;;  %vm1191_vm11 = vcmask 1046534   ;;  %s2359_s14 = scalar_lea.vmem %s1952_s12, 256  ;;  %p2364_p9 = scmp.lt.s32.totalorder %s1952_s12, %s1952_s12 }
  0x9c   :  { %2019 = vmatpush1.bf16.msra.mxu1 %v2018_v18  ;;  %v2028_v33 = vpack.c.bf16 %v408_v32, %v406_v31  ;;  %v407_v35 = vld [vmem:[#allocation19 + $0x70] sm:$0xff]  ;;  %v410_v37 = vld [vmem:[#allocation19 + $0x88] sm:$0xff]  ;;  %v412_v38 = vld [vmem:[#allocation19 + $0x98] sm:$0xff]  ;;  %vm1193_vm12 = vcmask 1047559   ;;  %p2360_p8 = scmp.ne.s32.totalorder %s1952_s12, %s2359_s14  ;;  %p2365_p10 = scmp.lt.s32.totalorder %s2359_s14, %s2359_s14 }
  0x9d   :  { %2021 = vmatprep.subr.bf16.mxu1 %v2020_v21  ;;  %v2030_v36 = vpack.c.bf16 %v407_v35, %v405_v34  ;;  %v2032_v39 = vpack.c.bf16 %v412_v38, %v410_v37  ;;  %v409_v40 = vld [vmem:[#allocation19 + $0x80] sm:$0xff]  ;;  %v411_v41 = vld [vmem:[#allocation19 + $0x90] sm:$0xff]  ;;  %v414_v42 = vld [vmem:[#allocation19 + $0xa8] sm:$0xff] }
  0x9e   :  { %206 = vmatpush1.bf16.msra.mxu0 %v2075_v7  ;;  %v2034_v43 = vpack.c.bf16 %v411_v41, %v409_v40  ;;  %v416_v44 = vld [vmem:[#allocation19 + $0xb8] sm:$0xff]  ;;  %v413_v45 = vld [vmem:[#allocation19 + $0xa0] sm:$0xff]  ;;  %v415_v46 = vld [vmem:[#allocation19 + $0xb0] sm:$0xff]  ;;  %v2609_v7 = vsub.s32 3, %v2594_v62  ;;  %p2366_p11 = por %p2365_p10, %p2364_p9 }
  0x9f   :  { %207 = vmatprep.subr.bf16.mxu0 %v2076_v8  ;;  %v2036_v47 = vpack.c.bf16 %v416_v44, %v414_v42  ;;  %v418_v48 = vld [vmem:[#allocation19 + $0xc8] sm:$0xff]  ;;  %v420_v49 = vld [vmem:[#allocation19 + $0xd8] sm:$0xff]  ;;  %v2038_v50 = vpack.c.bf16 %v415_v46, %v413_v45  ;;  %v417_v52 = vld [vmem:[#allocation19 + $0xc0] sm:$0xff] }
  0xa0   :  { %2023 = vmatpush1.bf16.msra.mxu1 %v2022_v24  ;;  %v2040_v51 = vpack.c.bf16 %v420_v49, %v418_v48  ;;  %v419_v53 = vld [vmem:[#allocation19 + $0xd0] sm:$0xff]  ;;  %v422_v54 = vld [vmem:[#allocation19 + $0xe8] sm:$0xff]  ;;  %v424_v55 = vld [vmem:[#allocation19 + $0xf8] sm:$0xff]  ;;  %p2367_p12 = pnand %p2366_p11, %p2360_p8 }
  0xa1   :  { %2025 = vmatprep.subr.bf16.mxu1 %v2024_v27  ;;  %v2042_v56 = vpack.c.bf16 %v419_v53, %v417_v52  ;;  %v2044_v57 = vpack.c.bf16 %v424_v55, %v422_v54  ;;  %v421_v58 = vld [vmem:[#allocation19 + $0xe0] sm:$0xff]  ;;  %v423_v59 = vld [vmem:[#allocation19 + $0xf0] sm:$0xff]  ;;  %v261_v2 = vld [vmem:[#allocation16] sm:$0xf] }
  0xa2   :  { %208 = vmatpush1.bf16.msra.mxu0 %v2078_v9  ;;  %v2046_v60 = vpack.c.bf16 %v423_v59, %v421_v58  ;;  %v282_v4 = vrot.slane %v261_v2, %v2597_v63  ;;  %v298_v5 = vrot.slane %v261_v2, %v2600_v0  ;;  %v274_v6 = vrot.slane %v261_v2, %v2603_v3 }
  0xa3   :  { %1996 = vmatprep.subr.bf16.mxu0 %v2408_v1  ;;  %v314_v10 = vrot.slane %v261_v2, %v2609_v7 }
  0xa4   :  { %2027 = vmatpush1.bf16.msra.mxu1 %v2026_v30  ;;  %v283_v8 = vmul.f32 0.0, %v282_v4  ;;  %v299_v9 = vmul.f32 0.0, %v298_v5  ;;  %v275_v11 = vmul.f32 0.0, %v274_v6 }
  0xa5   :  { %1976 = vmatmul.mubr.msk.bf16.vlgmr.msra.gmra.mrb[0].mxu0 %vm197_vm0, %v148_v12  ;;  %2029 = vmatprep.subr.bf16.mxu1 %v2028_v33  ;;  %v1977_v12 = vld [vmem:[#allocation17] ss:$0 sm:$0xff] }
  0xa6   :  { %v288_v14 = vrot.slane %v283_v8, 1  ;;  %v304_v15 = vrot.slane %v299_v9, 2  ;;  %v277_v22 = vadd.f32 %v1977_v12, %v275_v11  ;;  %2012 = vmatprep.mubr.msk.bf16.mxu0 %vm2410_vm4, %v2408_v1 }
  0xa8   :  { %2031 = vmatpush1.bf16.msra.mxu1 %v2030_v36 }
  0xa9   :  { %2033 = vmatprep.subr.bf16.mxu1 %v2032_v39 }
  0xac   :  { %2035 = vmatpush1.bf16.msra.mxu1 %v2034_v43 }
  0xad   :  { %2037 = vmatprep.subr.bf16.mxu1 %v2036_v47 }
  0xb0   :  { %2039 = vmatpush1.bf16.msra.mxu1 %v2038_v50 }
  0xb1   :  { %2041 = vmatprep.subr.bf16.mxu1 %v2040_v51 }
  0xb4   :  { %2043 = vmatpush1.bf16.msra.mxu1 %v2042_v56 }
  0xb5   :  { %2045 = vmatprep.subr.bf16.mxu1 %v2044_v57 }
  0xb8   :  { %2047 = vmatpush1.bf16.msra.mxu1 %v2046_v60 }
 0x178   :  { %v235_v13 = vpop.f32.mrb[0].mxu0 }
 0x179   :  { %v276_v16 = vmul.f32 %v274_v6, %v235_v13  ;;  %v284_v17 = vmul.f32 %v282_v4, %v235_v13  ;;  %v300_v18 = vmul.f32 %v298_v5, %v235_v13  ;;  %v2612_v19 = vpop.f32.mrb[1].mxu0  ;;  %v315_v20 = vmul.f32 %v314_v10, %v235_v13 }
 0x17a   :  { %v239_v21 = vpop.f32.mrb[2].mxu0 }
 0x17b   :  { %v278_v23 = vadd.f32 %v1977_v12, %v276_v16  ;;  %v289_v24 = vrot.slane %v284_v17, 1  ;;  %v305_v25 = vrot.slane %v300_v18, 2  ;;  %v343_v26 = vmul.f32 %v274_v6, %v239_v21  ;;  %v2614_v27 = vpop.f32.mrb[3].mxu0 }
 0x17c   :  { %v347_v28 = vmul.f32 %v282_v4, %v239_v21  ;;  %v358_v29 = vmul.f32 %v298_v5, %v239_v21  ;;  %v368_v35 = vmul.f32 %v314_v10, %v239_v21  ;;  %v317_v39 = vrot.slane %v315_v20, 3 }
 0x17d   :  { %v345_v30 = vadd.f32 %v1977_v12, %v343_v26  ;;  %v290_v31 = vsel %vm287_vm1, %v288_v14, %v289_v24  ;;  %v294_v32 = vadd.f32 %v289_v24, %v278_v23  ;;  %v306_v37 = vsel %vm303_vm2, %v304_v15, %v305_v25 }
 0x17e   :  { %v351_v33 = vrot.slane %v347_v28, 1  ;;  %v362_v34 = vrot.slane %v358_v29, 2  ;;  %v293_v36 = vadd.f32 %v290_v31, %v277_v22  ;;  %v370_v48 = vrot.slane %v368_v35, 3 }
 0x17f   :  { %v310_v38 = vadd.f32 %v305_v25, %v294_v32  ;;  %v806_v28 = vsub.s32 4, %v2594_v62  ;;  %v828_v31 = vsub.s32 6, %v2594_v62  ;;  %v839_v32 = vsub.s32 7, %v2594_v62 }
 0x180   :  { %v309_v40 = vadd.f32 %v306_v37, %v293_v36  ;;  %v352_v41 = vsel %vm287_vm1, %v288_v14, %v351_v33  ;;  %v356_v42 = vadd.f32 %v351_v33, %v345_v30  ;;  %v363_v46 = vsel %vm303_vm2, %v304_v15, %v362_v34 }
 0x181   :  { %v320_v43 = vadd.f32 %v317_v39, %v310_v38  ;;  %v355_v44 = vadd.f32 %v352_v41, %v277_v22  ;;  %v817_v30 = vsub.s32 5, %v2594_v62  ;;  %v1978_v41 = vld [vmem:[#allocation20] ss:$0 sm:$0xff] }
 0x182   :  { %v319_v45 = vadd.f32 %v317_v39, %v309_v40  ;;  %v367_v47 = vadd.f32 %v362_v34, %v356_v42 }
 0x183   :  { %v323_v49 = vsub.f32 0.0, %v320_v43  ;;  %v366_v50 = vadd.f32 %v363_v46, %v355_v44 }
 0x184   :  { %v322_v51 = vsub.f32 0.0, %v319_v45  ;;  %v373_v52 = vadd.f32 %v370_v48, %v367_v47 }
 0x185   :  { %v326_v53 = vmul.f32 1.442695, %v323_v49  ;;  %v372_v54 = vadd.f32 %v370_v48, %v366_v50 }
 0x186   :  { %v324_v55 = vmul.f32 1.442695, %v322_v51  ;;  %v376_v56 = vsub.f32 0.0, %v373_v52 }
 0x187   :  { %2087 = vpow2.f32 %v326_v53  ;;  %v375_v57 = vsub.f32 0.0, %v372_v54 }
 0x188   :  { %2089 = vpow2.f32 %v324_v55  ;;  %v379_v58 = vmul.f32 1.442695, %v376_v56 }
 0x189   :  { %v377_v59 = vmul.f32 1.442695, %v375_v57 }
 0x18a   :  { %2091 = vpow2.f32 %v379_v58 }
 0x18b   :  { %2093 = vpow2.f32 %v377_v59 }
 0x191   :  { %v2088_v60 = vpop.eup %2087 }
 0x192   :  { %v2090_v61 = vpop.eup %2089  ;;  %v329_v2 = vadd.f32 1.0, %v2088_v60 }
 0x193   :  { %v328_v4 = vadd.f32 1.0, %v2090_v61 }
 0x194   :  { %v2092_v5 = vpop.eup %2091  ;;  %2095 = vrcp.f32 %v329_v2 }
 0x195   :  { %2097 = vrcp.f32 %v328_v4  ;;  %v382_v6 = vadd.f32 1.0, %v2092_v5  ;;  %v2094_v8 = vpop.eup %2093 }
 0x196   :  { %v381_v9 = vadd.f32 1.0, %v2094_v8 }
 0x197   :  { %2099 = vrcp.f32 %v382_v6 }
 0x198   :  { %2101 = vrcp.f32 %v381_v9 }
 0x19e   :  { %v2096_v10 = vpop.eup %2095 }
 0x19f   :  { %v2098_v11 = vpop.eup %2097  ;;  %v335_v12 = vmul.f32 %v2096_v10, %v320_v43 }
 0x1a0   :  { %v334_v13 = vmul.f32 %v2098_v11, %v319_v45 }
 0x1a1   :  { %v2100_v14 = vpop.eup %2099  ;;  %337 = vst [vmem:[#allocation4 + $0x3] sm:$0x1f] %v335_v12  ;;  %v2675_v12 = vld [vmem:[#allocation22] sm:$0xff] }
 0x1a2   :  { %336 = vst [vmem:[#allocation4 - $0x5] sm:$0xe0] %v334_v13  ;;  %v388_v15 = vmul.f32 %v2100_v14, %v373_v52  ;;  %v2102_v16 = vpop.eup %2101 }
 0x1a3   :  { %v387_v17 = vmul.f32 %v2102_v16, %v372_v54  ;;  %v2409_v54 = vmov 1966171168  }
 0x1a4   :  { %390 = vst [vmem:[#allocation4 + $0xb] sm:$0x1f] %v388_v15  ;;  %v558_v55 = vunpack.c.l.s4 %v2409_v54  ;;  %v2679_v15 = vld [vmem:[#allocation22 + $0x8] sm:$0xff] }
 0x1a5   :  { %389 = vst [vmem:[#allocation4 + $0x3] sm:$0xe0] %v387_v17 }
 0x1a6   :  { %v559_v60 = vunpack.c.0.s8 %v558_v55 }
 0x1a8   :  { %v2660_v4 = vsub.s32 %v559_v60, %v2594_v62 }
 0x1a9   :  { %v2620_v18 = vld [vmem:[#allocation4] sm:$0xff] }
 0x1aa   :  { %490 = vmatmul.mubr.f32.vlgmr.msra.gmra.mrb[0].mxu1 %v2620_v18 }
 0x1ab   :  { %495 = vmatprep.mubr.f32.mxu1 %v2408_v1 }
 0x1ac   :  { %v2624_v20 = vld [vmem:[#allocation4 + $0x8] sm:$0xff] }
 0x1ae   :  { %496 = vmatmul.mubr.f32.gmra.mrb[2].mxu1 %v2624_v20 }
 0x27d   :  { %v491_v21 = vpop.f32.mrb[0].mxu1 }
 0x27e   :  { %v493_v22 = vpop.f32.mrb[1].mxu1  ;;  %v509_v42 = vadd.f32 %v1978_v41, %v491_v21 }
 0x27f   :  { %v774_v23 = vrot.slane %v493_v22, %v2597_v63  ;;  %v763_v24 = vrot.slane %v493_v22, %v2603_v3  ;;  %v785_v29 = vrot.slane %v493_v22, %v2600_v0  ;;  %v796_v37 = vrot.slane %v493_v22, %v2609_v7 }
 0x280   :  { %v807_v38 = vrot.slane %v493_v22, %v806_v28  ;;  %v818_v39 = vrot.slane %v493_v22, %v817_v30  ;;  %v829_v40 = vrot.slane %v493_v22, %v828_v31  ;;  %v513_v43 = vand.u32 2147483647, %v509_v42 }
 0x281   :  { %780 = vbcast.lane.b32.xlu1 %v774_v23, 264  ;;  %765 = vbcast.lane.b32.xlu0 %v763_v24, 256  ;;  %v2629_v25 = vpop.f32.mrb[2].mxu1  ;;  %v840_v45 = vrot.slane %v493_v22, %v839_v32  ;;  %v511_v2 = vmax.f32 %v509_v42, 0.0 }
 0x282   :  { %v2631_v26 = vpop.f32.mrb[3].mxu1  ;;  %v515_v44 = vsub.f32 0.0, %v513_v43  ;;  %v2663_v6 = vadd.f32 %v1978_v41, %v2629_v25 }
 0x283   :  { %v2639_v33 = vrot.slane %v2631_v26, %v806_v28  ;;  %v2642_v34 = vrot.slane %v2631_v26, %v817_v30  ;;  %v2645_v35 = vrot.slane %v2631_v26, %v828_v31  ;;  %v2648_v36 = vrot.slane %v2631_v26, %v839_v32 }
 0x284   :  { %v517_v46 = vmul.f32 1.442695, %v515_v44  ;;  %v1417_v49 = vrot.slane %v2631_v26, %v2603_v3  ;;  %v1428_v51 = vrot.slane %v2631_v26, %v2597_v63  ;;  %v1439_v57 = vrot.slane %v2631_v26, %v2600_v0 }
 0x285   :  { %791 = vbcast.lane.b32.xlu1 %v785_v29, 264  ;;  %769 = vbcast.lane.b32.xlu0 %v763_v24, 264  ;;  %v1450_v61 = vrot.slane %v2631_v26, %v2609_v7  ;;  %v514_v8 = vand.u32 2147483647, %v2663_v6 }
 0x286   :  { %2103 = vpow2.f32 %v517_v46 }
 0x287   :  { %v516_v62 = vsub.f32 0.0, %v514_v8 }
 0x289   :  { %802 = vbcast.lane.b32.xlu1 %v796_v37, 264  ;;  %776 = vbcast.lane.b32.xlu0 %v774_v23, 256  ;;  %v519_v10 = vmul.f32 1.442695, %v516_v62 }
 0x28d   :  { %813 = vbcast.lane.b32.xlu1 %v807_v38, 264  ;;  %787 = vbcast.lane.b32.xlu0 %v785_v29, 256 }
 0x290   :  { %v2104_v47 = vpop.eup %2103 }
 0x291   :  { %824 = vbcast.lane.b32.xlu1 %v818_v39, 264  ;;  %798 = vbcast.lane.b32.xlu0 %v796_v37, 256  ;;  %v521_v48 = vadd.f32 1.0, %v2104_v47  ;;  %v524_v50 = vmul.f32 -0.5, %v2104_v47  ;;  %v527_v56 = vand.u32 2147483647, %v2104_v47 }
 0x293   :  { %2105 = vlog2.f32 %v521_v48  ;;  %v525_v53 = vadd.f32 1.0, %v524_v50  ;;  %vm528_vm3 = vcmp.lt.f32.partialorder %v527_v56, 0.0004427343 }
 0x294   :  { %2107 = vpow2.f32 %v519_v10 }
 0x295   :  { %835 = vbcast.lane.b32.xlu1 %v829_v40, 264  ;;  %809 = vbcast.lane.b32.xlu0 %v807_v38, 256  ;;  %v526_v59 = vmul.f32 %v2104_v47, %v525_v53 }
 0x299   :  { %1043 = vbcast.lane.b32.xlu1 %v763_v24, 280  ;;  %820 = vbcast.lane.b32.xlu0 %v818_v39, 256 }
 0x29d   :  { %1051 = vbcast.lane.b32.xlu1 %v774_v23, 280  ;;  %831 = vbcast.lane.b32.xlu0 %v829_v40, 256  ;;  %v2106_v52 = vpop.eup %2105 }
 0x29e   :  { %v523_v58 = vmul.f32 0.6931472, %v2106_v52  ;;  %v2691_v31 = vpop.eup %2107 }
 0x29f   :  { %v530_v42 = vadd.f32 1.0, %v2691_v31 }
 0x2a0   :  { %v529_v63 = vsel %vm528_vm3, %v526_v59, %v523_v58 }
 0x2a1   :  { %1059 = vbcast.lane.b32.xlu1 %v785_v29, 280  ;;  %1039 = vbcast.lane.b32.xlu0 %v763_v24, 272  ;;  %v539_v5 = vadd.f32 %v529_v63, %v511_v2 }
 0x2a3   :  { %v563_v0 = vrot.slane %v539_v5, %v2660_v4  ;;  %v2683_v17 = vmul.f32 %v539_v5, %v2620_v18  ;;  %v556_v21 = vcombine.high %v539_v5, %v539_v5 }
 0x2a5   :  { %846 = vbcast.lane.b32.xlu1 %v840_v45, 264  ;;  %1047 = vbcast.lane.b32.xlu0 %v774_v23, 272  ;;  %v579_v7 = vrot.slane %v563_v0, %v2660_v4  ;;  %v571_v9 = vcombine.high %v563_v0, %v563_v0  ;;  %v718_v26 = vrot.slane %v2683_v17, %v2660_v4 }
 0x2a6   :  { %v570_v28 = vrot.slane %v556_v21, %v2660_v4  ;;  %v711_v58 = vcombine.high %v2683_v17, %v2683_v17 }
 0x2a7   :  { %v608_v11 = vrot.slane %v579_v7, %v2603_v3  ;;  %v593_v13 = vrot.slane %v571_v9, %v2660_v4  ;;  %v601_v24 = vcombine.high %v579_v7, %v579_v7  ;;  %v734_v47 = vrot.slane %v718_v26, %v2660_v4 }
 0x2a9   :  { %1067 = vbcast.lane.b32.xlu1 %v796_v37, 280  ;;  %1055 = vbcast.lane.b32.xlu0 %v785_v29, 272  ;;  %v645_v14 = vmul.f32 %v608_v11, %v2675_v12  ;;  %v612_v16 = vrot.slane %v593_v13, %v2603_v3  ;;  %v646_v22 = vmul.f32 %v608_v11, %v2679_v15 }
 0x2aa   :  { %v603_v29 = vcombine.high %v593_v13, %v593_v13  ;;  %v616_v18 = vrot.slane %v601_v24, %v2603_v3  ;;  %v851_v56 = vrot.slane %v734_v47, %v2603_v3 }
 0x2ab   :  { %v661_v23 = vmul.f32 1.442695, %v645_v14  ;;  %v647_v25 = vmul.f32 %v612_v16, %v2675_v12  ;;  %v663_v30 = vmul.f32 1.442695, %v646_v22  ;;  %v648_v32 = vmul.f32 %v612_v16, %v2679_v15 }
 0x2ac   :  { %v620_v41 = vrot.slane %v603_v29, %v2603_v3  ;;  %v650_v43 = vmul.f32 %v616_v18, %v2679_v15  ;;  %v725_v14 = vrot.slane %v711_v58, %v2660_v4 }
 0x2ad   :  { %1075 = vbcast.lane.b32.xlu1 %v807_v38, 280  ;;  %842 = vbcast.lane.b32.xlu0 %v840_v45, 256  ;;  %2109 = vpow2.f32 %v661_v23  ;;  %v667_v44 = vmul.f32 1.442695, %v648_v32  ;;  %v2079_v32 = vld [vmem:[#allocation23] sm:$0xff]  }
 0x2ae   :  { %2111 = vpow2.f32 %v663_v30  ;;  %v652_v50 = vmul.f32 %v620_v41, %v2679_v15  ;;  %v651_v54 = vmul.f32 %v620_v41, %v2675_v12  ;;  %1997 = vmatpush3.bf16.msra.mxu0 %v2079_v32  ;;  %v536_v32 = vand.u32 2147483647, %v2691_v31 }
 0x2af   :  { %1998 = vmatprep.subr.bf16.mxu0 %v2408_v1 }
 0x2b0   :  { %v675_v2 = vmul.f32 1.442695, %v652_v50  ;;  %v673_v9 = vmul.f32 1.442695, %v651_v54  ;;  %vm2786_vm5 = vcmp.lt.f32.partialorder %v536_v32, 0.0004427343 }
 0x2b1   :  { %1083 = vbcast.lane.b32.xlu1 %v818_v39, 280  ;;  %1063 = vbcast.lane.b32.xlu0 %v796_v37, 272  ;;  %v665_v37 = vmul.f32 1.442695, %v647_v25 }
 0x2b3   :  { %2113 = vpow2.f32 %v665_v37 }
 0x2b4   :  { %2115 = vlog2.f32 %v530_v42 }
 0x2b5   :  { %1091 = vbcast.lane.b32.xlu1 %v829_v40, 280  ;;  %1071 = vbcast.lane.b32.xlu0 %v807_v38, 272  ;;  %v726_v38 = vcombine.high %v718_v26, %v718_v26  ;;  %2117 = vpow2.f32 %v667_v44 }
 0x2b7   :  { %v748_v46 = vrot.slane %v726_v38, %v2660_v4  ;;  %v2110_v52 = vpop.eup %2109 }
 0x2b8   :  { %v2112_v7 = vpop.eup %2111 }
 0x2b9   :  { %1099 = vbcast.lane.b32.xlu1 %v840_v45, 280  ;;  %1079 = vbcast.lane.b32.xlu0 %v818_v39, 272  ;;  %v572_v39 = vcombine.high %v570_v28, %v570_v28  ;;  %v855_v55 = vrot.slane %v748_v46, %v2603_v3  ;;  %v758_v13 = vcombine.high %v748_v46, %v748_v46  ;;  %v923_v29 = vmul.f32 0.0, %v2112_v7 }
 0x2bb   :  { %v2704_v48 = vrot.slane %v572_v39, %v2660_v4  ;;  %v863_v38 = vrot.slane %v758_v13, %v2603_v3  ;;  %v2737_v39 = vrot.slane %v725_v14, %v2660_v4 }
 0x2bd   :  { %1419 = vbcast.lane.b32.xlu1 %v1417_v49, 256  ;;  %1087 = vbcast.lane.b32.xlu0 %v829_v40, 272  ;;  %v586_v40 = vrot.slane %v570_v28, %v2660_v4  ;;  %v628_v60 = vrot.slane %v2704_v48, %v2603_v3  ;;  %v604_v62 = vcombine.high %v2704_v48, %v2704_v48  ;;  %v2114_v17 = vpop.eup %2113 }
 0x2be   :  { %v2732_v37 = vpop.eup %2115  ;;  %v867_v54 = vrot.slane %v2737_v39, %v2603_v3  ;;  %v757_v13 = vcombine.high %v2737_v39, %v2737_v39 }
 0x2bf   :  { %v602_v59 = vcombine.high %v586_v40, %v586_v40  ;;  %v656_v25 = vmul.f32 %v628_v60, %v2679_v15  ;;  %v2118_v42 = vpop.eup %2117 }
 0x2c0   :  { %v875_v39 = vrot.slane %v757_v13, %v2603_v3 }
 0x2c1   :  { %1423 = vbcast.lane.b32.xlu1 %v1417_v49, 264  ;;  %1095 = vbcast.lane.b32.xlu0 %v840_v45, 272  ;;  %v649_v45 = vmul.f32 %v616_v18, %v2675_v12  ;;  %v632_v21 = vrot.slane %v602_v59, %v2603_v3  ;;  %v655_v18 = vmul.f32 %v628_v60, %v2675_v12  ;;  %v533_v59 = vmul.f32 -0.5, %v2691_v31 }
 0x2c3   :  { %v669_v53 = vmul.f32 1.442695, %v649_v45  ;;  %v683_v45 = vmul.f32 1.442695, %v656_v25  ;;  %v658_v46 = vmul.f32 %v632_v21, %v2679_v15  ;;  %v681_v50 = vmul.f32 1.442695, %v655_v18 }
 0x2c5   :  { %1434 = vbcast.lane.b32.xlu1 %v1428_v51, 264  ;;  %1430 = vbcast.lane.b32.xlu0 %v1428_v51, 256 }
 0x2c9   :  { %1445 = vbcast.lane.b32.xlu1 %v1439_v57, 264  ;;  %1441 = vbcast.lane.b32.xlu0 %v1439_v57, 256 }
 0x2cd   :  { %1456 = vbcast.lane.b32.xlu1 %v1450_v61, 264  ;;  %1452 = vbcast.lane.b32.xlu0 %v1450_v61, 256 }
 0x2d1   :  { %1467 = vbcast.lane.b32.xlu1 %v2639_v33, 264  ;;  %1463 = vbcast.lane.b32.xlu0 %v2639_v33, 256 }
 0x2d5   :  { %1478 = vbcast.lane.b32.xlu1 %v2642_v34, 264  ;;  %1474 = vbcast.lane.b32.xlu0 %v2642_v34, 256 }
 0x2d9   :  { %1489 = vbcast.lane.b32.xlu1 %v2645_v35, 264  ;;  %1485 = vbcast.lane.b32.xlu0 %v2645_v35, 256 }
 0x2dd   :  { %1676 = vbcast.lane.b32.xlu1 %v1417_v49, 280  ;;  %1672 = vbcast.lane.b32.xlu0 %v1417_v49, 272  ;;  %v624_v49 = vrot.slane %v586_v40, %v2603_v3  ;;  %v727_v40 = vcombine.high %v725_v14, %v725_v14 }
 0x2df   :  { %v654_v5 = vmul.f32 %v624_v49, %v2679_v15  ;;  %v653_v10 = vmul.f32 %v624_v49, %v2675_v12 }
 0x2e1   :  { %1684 = vbcast.lane.b32.xlu1 %v1428_v51, 280  ;;  %1680 = vbcast.lane.b32.xlu0 %v1428_v51, 272  ;;  %v671_v51 = vmul.f32 1.442695, %v650_v43  ;;  %v679_v24 = vmul.f32 1.442695, %v654_v5 }
 0x2e2   :  { %v677_v30 = vmul.f32 1.442695, %v653_v10 }
 0x2e3   :  { %2119 = vpow2.f32 %v671_v51  ;;  %v657_v51 = vmul.f32 %v632_v21, %v2675_v12 }
 0x2e4   :  { %2121 = vpow2.f32 %v669_v53 }
 0x2e5   :  { %1692 = vbcast.lane.b32.xlu1 %v1439_v57, 280  ;;  %1688 = vbcast.lane.b32.xlu0 %v1439_v57, 272  ;;  %v756_v57 = vcombine.high %v734_v47, %v734_v47  ;;  %2123 = vpow2.f32 %v675_v2  ;;  %v636_v47 = vrot.slane %v604_v62, %v2603_v3  ;;  %v685_v62 = vmul.f32 1.442695, %v657_v51 }
 0x2e6   :  { %2125 = vpow2.f32 %v673_v9 }
 0x2e7   :  { %v859_v11 = vrot.slane %v756_v57, %v2603_v3  ;;  %2127 = vpow2.f32 %v679_v24  ;;  %v660_v2 = vmul.f32 %v636_v47, %v2679_v15  ;;  %v659_v9 = vmul.f32 %v636_v47, %v2675_v12  ;;  %v2082_v24 = vld [vmem:[#allocation23 + $0x18] sm:$0xff]  }
 0x2e8   :  { %2129 = vpow2.f32 %v677_v30 }
 0x2e9   :  { %1500 = vbcast.lane.b32.xlu1 %v2648_v36, 264  ;;  %1496 = vbcast.lane.b32.xlu0 %v2648_v36, 256  ;;  %2131 = vpow2.f32 %v683_v45  ;;  %v689_v30 = vmul.f32 1.442695, %v659_v9 }
 0x2ea   :  { %2133 = vpow2.f32 %v681_v50 }
 0x2ed   :  { %1700 = vbcast.lane.b32.xlu1 %v1450_v61, 280  ;;  %1696 = vbcast.lane.b32.xlu0 %v1450_v61, 272  ;;  %v2120_v53 = vpop.eup %2119 }
 0x2ee   :  { %v2122_v58 = vpop.eup %2121 }
 0x2ef   :  { %v2124_v7 = vpop.eup %2123 }
 0x2f1   :  { %1708 = vbcast.lane.b32.xlu1 %v2639_v33, 280  ;;  %1704 = vbcast.lane.b32.xlu0 %v2639_v33, 272  ;;  %v922_v33 = vmul.f32 0.0, %v2110_v52  ;;  %v2080_v52 = vld [vmem:[#allocation23 + $0x8] sm:$0xff]  }
 0x2f2   :  { %1999 = vmatpush3.bf16.msra.mxu0 %v2080_v52 }
 0x2f3   :  { %v781_v61 = vpop.permute.xlu1 %780  ;;  %v766_v63 = vpop.permute.xlu0 %765  ;;  %2000 = vmatprep.subr.bf16.mxu0 %v2408_v1 }
 0x2f4   :  { %v891_v0 = vmul.f32 %v855_v55, %v781_v61  ;;  %v888_v8 = vmul.f32 %v851_v56, %v766_v63  ;;  %v687_v63 = vmul.f32 1.442695, %v658_v46  ;;  %v2083_v46 = vld [vmem:[#allocation23 + $0x20] sm:$0xff]  }
 0x2f5   :  { %1716 = vbcast.lane.b32.xlu1 %v2642_v34, 280  ;;  %1712 = vbcast.lane.b32.xlu0 %v2642_v34, 272 }
 0x2f6   :  { %v2725_v16 = vadd.f32 %v922_v33, %v888_v8  ;;  %2135 = vpow2.f32 %v687_v63 }
 0x2f7   :  { %v792_v22 = vpop.permute.xlu1 %791  ;;  %v770_v23 = vpop.permute.xlu0 %769  ;;  %2137 = vpow2.f32 %v685_v62 }
 0x2f8   :  { %v893_v26 = vmul.f32 %v859_v11, %v792_v22  ;;  %v889_v28 = vmul.f32 %v851_v56, %v770_v23  ;;  %v933_v34 = vmul.f32 %v2114_v17, %v2725_v16  ;;  %v2126_v17 = vpop.eup %2125  ;;  %v691_v23 = vmul.f32 1.442695, %v660_v2 }
 0x2f9   :  { %1724 = vbcast.lane.b32.xlu1 %v2645_v35, 280  ;;  %1720 = vbcast.lane.b32.xlu0 %v2645_v35, 272  ;;  %v2128_v18 = vpop.eup %2127 }
 0x2fa   :  { %v2739_v41 = vadd.f32 %v923_v29, %v889_v28  ;;  %2139 = vpow2.f32 %v691_v23 }
 0x2fb   :  { %v803_v43 = vpop.permute.xlu1 %802  ;;  %v777_v44 = vpop.permute.xlu0 %776  ;;  %2141 = vpow2.f32 %v689_v30 }
 0x2fc   :  { %v895_v48 = vmul.f32 %v863_v38, %v803_v43  ;;  %v890_v49 = vmul.f32 %v855_v55, %v777_v44  ;;  %v934_v35 = vmul.f32 %v2118_v42, %v2739_v41  ;;  %v2751_v55 = vrot.slane %v727_v40, %v2660_v4  ;;  %v2130_v43 = vpop.eup %2129 }
 0x2fd   :  { %1732 = vbcast.lane.b32.xlu1 %v2648_v36, 280  ;;  %1728 = vbcast.lane.b32.xlu0 %v2648_v36, 272 }
 0x2fe   :  { %v2753_v56 = vadd.f32 %v934_v35, %v891_v0  ;;  %v2755_v57 = vadd.f32 %v933_v34, %v890_v49  ;;  %v2081_v0 = vld [vmem:[#allocation23 + $0x10] sm:$0xff]   ;;  %v871_v10 = vrot.slane %v2751_v55, %v2603_v3  ;;  %v759_v23 = vcombine.high %v2751_v55, %v2751_v55 }
 0x2ff   :  { %v814_v60 = vpop.permute.xlu1 %813  ;;  %v788_v61 = vpop.permute.xlu0 %787  ;;  %2001 = vmatpush3.bf16.msra.mxu0 %v2081_v0 }
 0x300   :  { %v897_v36 = vmul.f32 %v867_v54, %v814_v60  ;;  %v892_v5 = vmul.f32 %v859_v11, %v788_v61  ;;  %v947_v8 = vmul.f32 %v2120_v53, %v2753_v56  ;;  %v946_v33 = vmul.f32 %v2122_v58, %v2755_v57  ;;  %2002 = vmatprep.subr.bf16.mxu0 %v2408_v1  ;;  %v2084_v61 = vld [vmem:[#allocation23 + $0x28] sm:$0xff]  }
 0x302   :  { %v2767_v14 = vadd.f32 %v947_v8, %v893_v26  ;;  %v2769_v11 = vadd.f32 %v946_v33, %v892_v5  ;;  %v534_v26 = vadd.f32 1.0, %v533_v59  ;;  %v512_v8 = vmax.f32 %v2663_v6, 0.0 }
 0x303   :  { %v825_v21 = vpop.permute.xlu1 %824  ;;  %v799_v22 = vpop.permute.xlu0 %798  ;;  %2003 = vmatpush3.bf16.msra.mxu0 %v2082_v24 }
 0x304   :  { %v899_v25 = vmul.f32 %v871_v10, %v825_v21  ;;  %v894_v28 = vmul.f32 %v863_v38, %v799_v22  ;;  %v960_v29 = vmul.f32 %v2124_v7, %v2767_v14  ;;  %v959_v34 = vmul.f32 %v2126_v17, %v2769_v11  ;;  %2004 = vmatprep.subr.bf16.mxu0 %v2408_v1 }
 0x305   :  { %v532_v38 = vmul.f32 0.6931472, %v2732_v37  ;;  %v535_v51 = vmul.f32 %v2691_v31, %v534_v26  ;;  %v2086_v26 = vld [vmem:[#allocation23 + $0x38] sm:$0xff]  }
 0x306   :  { %v2777_v40 = vadd.f32 %v960_v29, %v895_v48  ;;  %v2779_v42 = vadd.f32 %v959_v34, %v894_v28  ;;  %v2132_v48 = vpop.eup %2131 }
 0x307   :  { %v836_v44 = vpop.permute.xlu1 %835  ;;  %v810_v45 = vpop.permute.xlu0 %809  ;;  %2005 = vmatpush3.bf16.msra.mxu0 %v2083_v46 }
 0x308   :  { %v901_v47 = vmul.f32 %v875_v39, %v836_v44  ;;  %v896_v49 = vmul.f32 %v867_v54, %v810_v45  ;;  %v973_v35 = vmul.f32 %v2128_v18, %v2777_v40  ;;  %v972_v50 = vmul.f32 %v2130_v43, %v2779_v42  ;;  %v2134_v58 = vpop.eup %2133  ;;  %2006 = vmatprep.subr.bf16.mxu0 %v2408_v1 }
 0x309   :  { %v538_v54 = vsel %vm2786_vm5, %v535_v51, %v532_v38  ;;  %v879_v38 = vrot.slane %v759_v23, %v2603_v3 }
 0x30a   :  { %v2790_v37 = vadd.f32 %v973_v35, %v897_v36  ;;  %v2792_v53 = vadd.f32 %v972_v50, %v896_v49  ;;  %v2136_v36 = vpop.eup %2135  ;;  %v2805_v62 = vadd.f32 %v538_v54, %v512_v8 }
 0x30b   :  { %v1044_v59 = vpop.permute.xlu1 %1043  ;;  %v821_v60 = vpop.permute.xlu0 %820  ;;  %2007 = vmatpush3.bf16.msra.mxu0 %v2084_v61 }
 0x30c   :  { %v1102_v63 = vmul.f32 %v1044_v59, %v2739_v41  ;;  %v898_v31 = vmul.f32 %v871_v10, %v821_v60  ;;  %v986_v2 = vmul.f32 %v2132_v48, %v2790_v37  ;;  %v985_v5 = vmul.f32 %v2134_v58, %v2792_v53  ;;  %v2138_v7 = vpop.eup %2137  ;;  %v2085_v41 = vld [vmem:[#allocation23 + $0x30] sm:$0xff]   ;;  %2008 = vmatprep.subr.bf16.mxu0 %v2408_v1 }
 0x30d   :  { %v2140_v6 = vpop.eup %2139  ;;  %v1217_v29 = vrot.slane %v2805_v62, %v2660_v4 }
 0x30e   :  { %v2801_v33 = vadd.f32 %v986_v2, %v899_v25  ;;  %v2803_v0 = vadd.f32 %v985_v5, %v898_v31  ;;  %v2142_v28 = vpop.eup %2141 }
 0x30f   :  { %v1052_v9 = vpop.permute.xlu1 %1051  ;;  %v832_v13 = vpop.permute.xlu0 %831  ;;  %2009 = vmatpush3.bf16.msra.mxu0 %v2085_v41  ;;  %v2827_v45 = vrot.slane %v1217_v29, %v2660_v4  ;;  %v1225_v51 = vcombine.high %v1217_v29, %v1217_v29 }
 0x310   :  { %v1104_v10 = vmul.f32 %v1052_v9, %v2753_v56  ;;  %v900_v17 = vmul.f32 %v875_v39, %v832_v13  ;;  %v999_v21 = vmul.f32 %v2136_v36, %v2801_v33  ;;  %v998_v22 = vmul.f32 %v2138_v7, %v2803_v0  ;;  %2010 = vmatprep.subr.bf16.mxu0 %v2408_v1 }
 0x311   :  { %v244_v39 = vsub.f32 0.0, %v2612_v19  ;;  %v1262_v59 = vrot.slane %v2827_v45, %v2603_v3  ;;  %v2837_v5 = vrot.slane %v1225_v51, %v2660_v4 }
 0x312   :  { %v2813_v24 = vadd.f32 %v999_v21, %v901_v47  ;;  %v2815_v25 = vadd.f32 %v998_v22, %v900_v17 }
 0x313   :  { %v1060_v56 = vpop.permute.xlu1 %1059  ;;  %v1040_v34 = vpop.permute.xlu0 %1039  ;;  %2011 = vmatpush3.bf16.msra.mxu0 %v2086_v26  ;;  %v1266_v22 = vrot.slane %v2837_v5, %v2603_v3  ;;  %v1210_v26 = vcombine.high %v2805_v62, %v2805_v62 }
 0x314   :  { %v1106_v30 = vmul.f32 %v1060_v56, %v2767_v14  ;;  %v1101_v18 = vmul.f32 %v1040_v34, %v2725_v16  ;;  %v1012_v32 = vmul.f32 %v2140_v6, %v2813_v24  ;;  %v1011_v55 = vmul.f32 %v2142_v28, %v2815_v25 }
 0x315   :  { %v246_v16 = vmul.f32 1.442695, %v244_v39 }
 0x316   :  { %v1117_v43 = vadd.f32 %v1102_v63, %v1101_v18  ;;  %v2854_v18 = vmul.f32 %v2805_v62, %v2624_v20 }
 0x317   :  { %v847_v44 = vpop.permute.xlu1 %846  ;;  %v1048_v47 = vpop.permute.xlu0 %1047  ;;  %2143 = vpow2.f32 %v246_v16 }
 0x318   :  { %v1118_v46 = vrot.slane %v1117_v43, 4  ;;  %v903_v14 = vmul.f32 %v879_v38, %v847_v44  ;;  %v1103_v49 = vmul.f32 %v1048_v47, %v2755_v57 }
 0x31a   :  { %v1119_v35 = vadd.f32 %v1118_v46, %v1117_v43  ;;  %v2830_v50 = vadd.f32 %v1012_v32, %v903_v14  ;;  %v1124_v1 = vadd.f32 %v1104_v10, %v1103_v49  ;;  %v1302_v14 = vmul.f32 %v1266_v22, %v2679_v15 }
 0x31b   :  { %v1068_v48 = vpop.permute.xlu1 %1067  ;;  %v1056_v54 = vpop.permute.xlu0 %1055  ;;  %v2861_v49 = vrot.slane %v1210_v26, %v2660_v4 }
 0x31c   :  { %v1120_v52 = vrot.slane %v1119_v35, 2  ;;  %v1108_v58 = vmul.f32 %v1068_v48, %v2777_v40  ;;  %v1125_v60 = vrot.slane %v1124_v1, 4  ;;  %v1105_v61 = vmul.f32 %v1056_v54, %v2769_v11 }
 0x31d   :  { %v1300_v40 = vmul.f32 %v1262_v59, %v2679_v15 }
 0x31e   :  { %v1121_v63 = vadd.f32 %v1120_v52, %v1119_v35  ;;  %v1126_v31 = vadd.f32 %v1125_v60, %v1124_v1  ;;  %v1131_v57 = vadd.f32 %v1106_v30, %v1105_v61  ;;  %v1255_v30 = vcombine.high %v2827_v45, %v2827_v45 }
 0x31f   :  { %v1076_v2 = vpop.permute.xlu1 %1075  ;;  %v843_v8 = vpop.permute.xlu0 %842  ;;  %v1317_v28 = vmul.f32 1.442695, %v1300_v40  ;;  %v1372_v35 = vrot.slane %v2854_v18, %v2660_v4 }
 0x320   :  { %v1110_v36 = vmul.f32 %v1076_v2, %v2790_v37  ;;  %v1127_v7 = vrot.slane %v1126_v31, 2  ;;  %v1132_v9 = vrot.slane %v1131_v57, 4  ;;  %v902_v13 = vmul.f32 %v879_v38, %v843_v8 }
 0x321   :  { %v1122_v41 = vrot.slane %v1121_v63, 1  ;;  %v1299_v37 = vmul.f32 %v1262_v59, %v2675_v12  ;;  %2145 = vpow2.f32 %v1317_v28  ;;  %v1321_v59 = vmul.f32 1.442695, %v1302_v14 }
 0x322   :  { %v1128_v10 = vadd.f32 %v1127_v7, %v1126_v31  ;;  %v1133_v17 = vadd.f32 %v1132_v9, %v1131_v57  ;;  %v2841_v11 = vadd.f32 %v1011_v55, %v902_v13  ;;  %v1226_v57 = vcombine.high %v2861_v49, %v2861_v49 }
 0x323   :  { %v1084_v21 = vpop.permute.xlu1 %1083  ;;  %v1064_v23 = vpop.permute.xlu0 %1063  ;;  %v1123_v32 = vadd.f32 %v1122_v41, %v1121_v63  ;;  %v1315_v46 = vmul.f32 1.442695, %v1299_v37  ;;  %v2873_v2 = vrot.slane %v1372_v35, %v2660_v4  ;;  %v1257_v9 = vcombine.high %v2837_v5, %v2837_v5 }
 0x324   :  { %v1112_v6 = vmul.f32 %v1084_v21, %v2801_v33  ;;  %v1129_v29 = vrot.slane %v1128_v10, 1  ;;  %v1134_v56 = vrot.slane %v1133_v17, 2  ;;  %v1107_v34 = vmul.f32 %v1064_v23, %v2779_v42  ;;  %v2144_v33 = vpop.eup %2143 }
 0x325   :  { %v250_v62 = vadd.f32 1.0, %v2144_v33  ;;  %2147 = vpow2.f32 %v1315_v46  ;;  %v1505_v37 = vrot.slane %v2873_v2, %v2603_v3 }
 0x326   :  { %v1130_v55 = vadd.f32 %v1129_v29, %v1128_v10  ;;  %v1135_v39 = vadd.f32 %v1134_v56, %v1133_v17  ;;  %v1138_v43 = vadd.f32 %v1108_v58, %v1107_v34 }
 0x327   :  { %v1092_v38 = vpop.permute.xlu1 %1091  ;;  %v1072_v42 = vpop.permute.xlu0 %1071  ;;  %2149 = vrcp.f32 %v250_v62 }
 0x328   :  { %v1114_v44 = vmul.f32 %v1092_v38, %v2813_v24  ;;  %v1182_v45 = vsel %vm1181_vm6, %v1130_v55, %v1123_v32  ;;  %v1136_v47 = vrot.slane %v1135_v39, 1  ;;  %v1139_v16 = vrot.slane %v1138_v43, 4 }
 0x329   :  { %v1109_v20 = vmul.f32 %v1072_v42, %v2792_v53  ;;  %v1270_v24 = vrot.slane %v1255_v30, %v2603_v3  ;;  %v1301_v53 = vmul.f32 %v1266_v22, %v2675_v12  ;;  %2151 = vpow2.f32 %v1321_v59 }
 0x32a   :  { %v1137_v1 = vadd.f32 %v1136_v47, %v1135_v39  ;;  %v1140_v48 = vadd.f32 %v1139_v16, %v1138_v43  ;;  %v1274_v30 = vrot.slane %v1257_v9, %v2603_v3 }
 0x32b   :  { %v1145_v51 = vadd.f32 %v1110_v36, %v1109_v20  ;;  %v1100_v52 = vpop.permute.xlu1 %1099  ;;  %v1080_v54 = vpop.permute.xlu0 %1079  ;;  %v1304_v41 = vmul.f32 %v1270_v24, %v2679_v15  ;;  %v1303_v28 = vmul.f32 %v1270_v24, %v2675_v12 }
 0x32c   :  { %v1116_v58 = vmul.f32 %v1100_v52, %v2830_v50  ;;  %v1184_v60 = vsel %vm1183_vm7, %v1137_v1, %v1182_v45  ;;  %v1141_v61 = vrot.slane %v1140_v48, 2  ;;  %v1111_v31 = vmul.f32 %v1080_v54, %v2803_v0  ;;  %v2146_v23 = vpop.eup %2145 }
 0x32d   :  { %v1146_v63 = vrot.slane %v1145_v51, 4  ;;  %v2877_v50 = vrot.slane %v2861_v49, %v2660_v4  ;;  %v1319_v0 = vmul.f32 1.442695, %v1301_v53  ;;  %v1325_v55 = vmul.f32 1.442695, %v1304_v41 }
 0x32e   :  { %v1142_v36 = vadd.f32 %v1141_v61, %v1140_v48  ;;  %v1152_v40 = vadd.f32 %v1112_v6, %v1111_v31  ;;  %v1380_v6 = vcombine.high %v1372_v35, %v1372_v35  ;;  %v1323_v62 = vmul.f32 1.442695, %v1303_v28 }
 0x32f   :  { %v1147_v8 = vadd.f32 %v1146_v63, %v1145_v51  ;;  %v1420_v7 = vpop.permute.xlu1 %1419  ;;  %v1088_v13 = vpop.permute.xlu0 %1087  ;;  %2153 = vpow2.f32 %v1319_v0  ;;  %v1306_v52 = vmul.f32 %v1274_v30, %v2679_v15  ;;  %v1278_v41 = vrot.slane %v2877_v50, %v2603_v3 }
 0x330   :  { %v1143_v10 = vrot.slane %v1142_v36, 1  ;;  %v1153_v21 = vrot.slane %v1152_v40, 4  ;;  %v1113_v22 = vmul.f32 %v1088_v13, %v2815_v25  ;;  %v2148_v42 = vpop.eup %2147  ;;  %v2890_v14 = vrot.slane %v1380_v6, %v2660_v4 }
 0x331   :  { %v1148_v17 = vrot.slane %v1147_v8, 2  ;;  %v2892_v35 = vpop.eup %2149  ;;  %v1542_v24 = vmul.f32 %v1505_v37, %v1420_v7  ;;  %2155 = vpow2.f32 %v1325_v55  ;;  %v1576_v63 = vmul.f32 0.0, %v2148_v42 }
 0x332   :  { %v1144_v29 = vadd.f32 %v1143_v10, %v1142_v36  ;;  %v1154_v56 = vadd.f32 %v1153_v21, %v1152_v40  ;;  %v1159_v34 = vadd.f32 %v1114_v44, %v1113_v22  ;;  %v1577_v44 = vmul.f32 0.0, %v2146_v23 }
 0x333   :  { %v1149_v5 = vadd.f32 %v1148_v17, %v1147_v8  ;;  %v1424_v26 = vpop.permute.xlu1 %1423  ;;  %v1096_v33 = vpop.permute.xlu0 %1095  ;;  %v1509_v61 = vrot.slane %v2890_v14, %v2603_v3  ;;  %2157 = vpow2.f32 %v1323_v62  ;;  %v1305_v8 = vmul.f32 %v1274_v30, %v2675_v12 }
 0x334   :  { %v1543_v32 = vmul.f32 %v1505_v37, %v1424_v26  ;;  %v1186_v25 = vsel %vm1185_vm8, %v1144_v29, %v1184_v60  ;;  %v1155_v43 = vrot.slane %v1154_v56, 2  ;;  %v1160_v38 = vrot.slane %v1159_v34, 4  ;;  %v2152_v59 = vpop.eup %2151 }
 0x335   :  { %v1150_v39 = vrot.slane %v1149_v5, 1  ;;  %v1115_v46 = vmul.f32 %v1096_v33, %v2841_v11  ;;  %v2901_v13 = vadd.f32 %v1576_v63, %v1542_v24  ;;  %v1329_v21 = vmul.f32 1.442695, %v1306_v52 }
 0x336   :  { %v1156_v47 = vadd.f32 %v1155_v43, %v1154_v56  ;;  %v1161_v16 = vadd.f32 %v1160_v38, %v1159_v34  ;;  %v2894_v51 = vadd.f32 %v1577_v44, %v1543_v32  ;;  %v1410_v6 = vcombine.high %v2873_v2, %v2873_v2  ;;  %v1828_v43 = vld [vmem:[#allocation4] sm:$0xff] }
 0x337   :  { %v1151_v45 = vadd.f32 %v1150_v39, %v1149_v5  ;;  %v1435_v20 = vpop.permute.xlu1 %1434  ;;  %v1166_v1 = vadd.f32 %v1116_v58, %v1115_v46  ;;  %v1431_v48 = vpop.permute.xlu0 %1430  ;;  %v1327_v5 = vmul.f32 1.442695, %v1305_v8  ;;  %v2916_v33 = vrot.slane %v1226_v57, %v2660_v4 }
 0x338   :  { %v1157_v54 = vrot.slane %v1156_v47, 1  ;;  %v1162_v53 = vrot.slane %v1161_v16, 2  ;;  %v1545_v7 = vmul.f32 %v1509_v61, %v1435_v20  ;;  %v1587_v0 = vmul.f32 %v2152_v59, %v2894_v51 }
 0x339   :  { %v1188_v11 = vsel %vm1187_vm9, %v1151_v45, %v1186_v25  ;;  %v1167_v60 = vrot.slane %v1166_v1, 4  ;;  %v2154_v22 = vpop.eup %2153  ;;  %v1544_v37 = vmul.f32 %v1509_v61, %v1431_v48  ;;  %2159 = vpow2.f32 %v1329_v21 }
 0x33a   :  { %v1158_v31 = vadd.f32 %v1157_v54, %v1156_v47  ;;  %v1163_v36 = vadd.f32 %v1162_v53, %v1161_v16  ;;  %v1586_v26 = vmul.f32 %v2154_v22, %v2901_v13  ;;  %v2910_v30 = vadd.f32 %v1587_v0, %v1545_v7 }
 0x33b   :  { %v1446_v58 = vpop.permute.xlu1 %1445  ;;  %v1168_v40 = vadd.f32 %v1167_v60, %v1166_v1  ;;  %v1442_v9 = vpop.permute.xlu0 %1441  ;;  %v1308_v2 = vmul.f32 %v1278_v41, %v2679_v15  ;;  %v1513_v25 = vrot.slane %v1410_v6, %v2603_v3  ;;  %2161 = vpow2.f32 %v1327_v5 }
 0x33c   :  { %v1190_v10 = vsel %vm1189_vm10, %v1158_v31, %v1188_v11  ;;  %v1164_v17 = vrot.slane %v1163_v36, 1  ;;  %v2921_v39 = vadd.f32 %v1586_v26, %v1544_v37  ;;  %v2156_v38 = vpop.eup %2155  ;;  %v1307_v46 = vmul.f32 %v1278_v41, %v2675_v12 }
 0x33d   :  { %v1169_v23 = vrot.slane %v1168_v40, 2  ;;  %v1547_v57 = vmul.f32 %v1513_v25, %v1446_v58  ;;  %v1597_v45 = vmul.f32 %v2156_v38, %v2910_v30  ;;  %v2158_v47 = vpop.eup %2157  ;;  %v1282_v16 = vrot.slane %v2916_v33, %v2603_v3 }
 0x33e   :  { %v1165_v28 = vadd.f32 %v1164_v17, %v1163_v36  ;;  %v1365_v20 = vcombine.high %v2854_v18, %v2854_v18  ;;  %v1333_v62 = vmul.f32 1.442695, %v1308_v2  ;;  %v1830_v24 = vmul.f32 128.0, %v1828_v43 }
 0x33f   :  { %v1457_v29 = vpop.permute.xlu1 %1456  ;;  %v1170_v56 = vadd.f32 %v1169_v23, %v1168_v40  ;;  %v1453_v34 = vpop.permute.xlu0 %1452  ;;  %v1546_v1 = vmul.f32 %v1513_v25, %v1442_v9  ;;  %v1412_v48 = vcombine.high %v2890_v14, %v2890_v14  ;;  %v1596_v52 = vmul.f32 %v2158_v47, %v2921_v39 }
 0x340   :  { %v1192_v32 = vsel %vm1191_vm11, %v1165_v28, %v1190_v10  ;;  %v256_v54 = vmul.f32 %v2892_v35, %v2612_v19  ;;  %v1331_v59 = vmul.f32 1.442695, %v1307_v46  ;;  %v2937_v63 = vadd.f32 %v1597_v45, %v1547_v57 }
 0x341   :  { %v1171_v55 = vrot.slane %v1170_v56, 1  ;;  %v1256_v18 = vcombine.high %v2877_v50, %v2877_v50  ;;  %2163 = vpow2.f32 %v1333_v62  ;;  %v1310_v14 = vmul.f32 %v1282_v16, %v2679_v15 }
 0x342   :  { %v1517_v36 = vrot.slane %v1412_v48, %v2603_v3  ;;  %v1379_v58 = vrot.slane %v1365_v20, %v2660_v4  ;;  %v1600_v19 = vadd.f32 %v1596_v52, %v1546_v1  ;;  %2165 = vpow2.f32 %v1331_v59 }
 0x343   :  { %v1468_v42 = vpop.permute.xlu1 %1467  ;;  %v1172_v49 = vadd.f32 %v1171_v55, %v1170_v56  ;;  %v1464_v44 = vpop.permute.xlu0 %1463  ;;  %v1309_v40 = vmul.f32 %v1282_v16, %v2675_v12  ;;  %v1286_v41 = vrot.slane %v1256_v18, %v2603_v3  ;;  %v1337_v10 = vmul.f32 1.442695, %v1310_v14 }
 0x344   :  { %v2160_v35 = vpop.eup %2159  ;;  %v1549_v7 = vmul.f32 %v1517_v36, %v1457_v29  ;;  %v1548_v17 = vmul.f32 %v1517_v36, %v1453_v34  ;;  %v2954_v21 = vrot.slane %v1379_v58, %v2660_v4  ;;  %v1258_v29 = vcombine.high %v2916_v33, %v2916_v33 }
 0x345   :  { %v1194_v11 = vsel %vm1193_vm12, %v1172_v49, %v1192_v32  ;;  %v1607_v50 = vmul.f32 %v2160_v35, %v2937_v63  ;;  %v2162_v0 = vpop.eup %2161  ;;  %v1335_v37 = vmul.f32 1.442695, %v1309_v40  ;;  %2167 = vpow2.f32 %v1337_v10 }
 0x346   :  { %v1832_v60 = vadd.f32 %v1830_v24, %v1194_v11  ;;  %v1606_v22 = vmul.f32 %v2162_v0, %v1600_v19  ;;  %v1312_v5 = vmul.f32 %v1286_v41, %v2679_v15  ;;  %v1521_v56 = vrot.slane %v2954_v21, %v2603_v3 }
 0x347   :  { %v1479_v53 = vpop.permute.xlu1 %1478  ;;  %v2935_v61 = vpop.permute.xlu0 %1474  ;;  %v1611_v28 = vadd.f32 %v1607_v50, %v1549_v7  ;;  %v1381_v26 = vcombine.high %v1379_v58, %v1379_v58  ;;  %2169 = vpow2.f32 %v1335_v37  ;;  %v1311_v55 = vmul.f32 %v1286_v41, %v2675_v12 }
 0x348   :  { %v2942_v31 = vmul.f32 %v1832_v60, %v256_v54  ;;  %v1610_v32 = vadd.f32 %v1606_v22, %v1548_v17  ;;  %v1551_v25 = vmul.f32 %v1521_v56, %v1468_v42  ;;  %v1341_v49 = vmul.f32 1.442695, %v1312_v5 }
 0x349   :  { %v1290_v33 = vrot.slane %v1258_v29, %v2603_v3  ;;  %v1550_v57 = vmul.f32 %v1521_v56, %v1464_v44  ;;  %v2964_v45 = vrot.slane %v1381_v26, %v2660_v4  ;;  %v1339_v20 = vmul.f32 1.442695, %v1311_v55 }
 0x34a   :  { %2171 = vpow2.f32 %v1341_v49  ;;  %v245_v11 = vsub.f32 0.0, %v2614_v27 }
 0x34b   :  { %v2946_v8 = vpop.permute.xlu1 %1489  ;;  %v2949_v9 = vpop.permute.xlu0 %1485  ;;  %v1314_v1 = vmul.f32 %v1290_v33, %v2679_v15  ;;  %v1525_v42 = vrot.slane %v2964_v45, %v2603_v3  ;;  %2173 = vpow2.f32 %v1339_v20  ;;  %v1313_v4 = vmul.f32 %v1290_v33, %v2675_v12 }
 0x34c   :  { %v2164_v34 = vpop.eup %2163  ;;  %v1411_v15 = vcombine.high %v2954_v21, %v2954_v21  ;;  %v248_v22 = vmul.f32 1.442695, %v245_v11 }
 0x34d   :  { %v1617_v38 = vmul.f32 %v2164_v34, %v1611_v28  ;;  %v2166_v46 = vpop.eup %2165  ;;  %v1553_v44 = vmul.f32 %v1525_v42, %v1479_v53  ;;  %v1345_v40 = vmul.f32 1.442695, %v1314_v1  ;;  %v1552_v7 = vmul.f32 %v1525_v42, %v2935_v61 }
 0x34e   :  { %v1616_v47 = vmul.f32 %v2166_v46, %v1610_v32  ;;  %v1343_v0 = vmul.f32 1.442695, %v1313_v4 }
 0x34f   :  { %v1677_v23 = vpop.permute.xlu1 %1676  ;;  %v1673_v6 = vpop.permute.xlu0 %1672  ;;  %v1621_v24 = vadd.f32 %v1617_v38, %v1551_v25  ;;  %2175 = vpow2.f32 %v1345_v40 }
 0x350   :  { %v1620_v48 = vadd.f32 %v1616_v47, %v1550_v57  ;;  %v2168_v52 = vpop.eup %2167  ;;  %v1734_v50 = vmul.f32 %v1673_v6, %v2901_v13  ;;  %v1735_v12 = vmul.f32 %v1677_v23, %v2894_v51  ;;  %v1413_v13 = vcombine.high %v2964_v45, %v2964_v45 }
 0x351   :  { %v1627_v14 = vmul.f32 %v2168_v52, %v1621_v24  ;;  %v2170_v36 = vpop.eup %2169  ;;  %2177 = vpow2.f32 %v1343_v0 }
 0x352   :  { %v1626_v53 = vmul.f32 %v2170_v36, %v1620_v48  ;;  %2179 = vpow2.f32 %v248_v22  ;;  %v1533_v57 = vrot.slane %v1413_v13, %v2603_v3 }
 0x353   :  { %v1685_v2 = vpop.permute.xlu1 %1684  ;;  %v1681_v43 = vpop.permute.xlu0 %1680  ;;  %v1631_v17 = vadd.f32 %v1627_v14, %v1553_v44 }
 0x354   :  { %v1736_v59 = vmul.f32 %v1681_v43, %v2921_v39  ;;  %v1737_v60 = vmul.f32 %v1685_v2, %v2910_v30  ;;  %v1630_v29 = vadd.f32 %v1626_v53, %v1552_v7  ;;  %v2172_v61 = vpop.eup %2171 }
 0x355   :  { %v1637_v26 = vmul.f32 %v2172_v61, %v1631_v17  ;;  %v2174_v34 = vpop.eup %2173 }
 0x356   :  { %v1757_v30 = vadd.f32 %v1737_v60, %v1736_v59  ;;  %v1636_v38 = vmul.f32 %v2174_v34, %v1630_v29 }
 0x357   :  { %v1693_v16 = vpop.permute.xlu1 %1692  ;;  %v1689_v62 = vpop.permute.xlu0 %1688 }
 0x358   :  { %v1738_v58 = vmul.f32 %v1689_v62, %v1600_v19  ;;  %v1739_v35 = vmul.f32 %v1693_v16, %v2937_v63  ;;  %v1529_v63 = vrot.slane %v1411_v15, %v2603_v3  ;;  %v1750_v19 = vadd.f32 %v1735_v12, %v1734_v50 }
 0x359   :  { %v1758_v5 = vrot.slane %v1757_v30, 4  ;;  %v2176_v52 = vpop.eup %2175 }
 0x35a   :  { %v1764_v37 = vadd.f32 %v1739_v35, %v1738_v58  ;;  %v1555_v6 = vmul.f32 %v1529_v63, %v2946_v8  ;;  %v1554_v55 = vmul.f32 %v1529_v63, %v2949_v9  ;;  %v1751_v25 = vrot.slane %v1750_v19, 4 }
 0x35b   :  { %v1501_v54 = vpop.permute.xlu1 %1500  ;;  %v1497_v18 = vpop.permute.xlu0 %1496  ;;  %v1759_v33 = vadd.f32 %v1758_v5, %v1757_v30 }
 0x35c   :  { %v1641_v47 = vadd.f32 %v1637_v26, %v1555_v6  ;;  %v1557_v1 = vmul.f32 %v1533_v57, %v1501_v54  ;;  %v1556_v59 = vmul.f32 %v1533_v57, %v1497_v18  ;;  %v2178_v3 = vpop.eup %2177 }
 0x35d   :  { %v1760_v44 = vrot.slane %v1759_v33, 2  ;;  %v2180_v54 = vpop.eup %2179 }
 0x35e   :  { %v1647_v36 = vmul.f32 %v2176_v52, %v1641_v47  ;;  %v251_v63 = vadd.f32 1.0, %v2180_v54 }
 0x35f   :  { %v1701_v39 = vpop.permute.xlu1 %1700  ;;  %v1697_v41 = vpop.permute.xlu0 %1696 }
 0x360   :  { %v1741_v10 = vmul.f32 %v1701_v39, %v1611_v28  ;;  %v1740_v21 = vmul.f32 %v1697_v41, %v1610_v32  ;;  %v1765_v32 = vrot.slane %v1764_v37, 4  ;;  %v1651_v12 = vadd.f32 %v1647_v36, %v1557_v1 }
 0x361   :  { %v1761_v41 = vadd.f32 %v1760_v44, %v1759_v33  ;;  %2181 = vrcp.f32 %v251_v63 }
 0x362   :  { %v1771_v51 = vadd.f32 %v1741_v10, %v1740_v21  ;;  %v1766_v16 = vadd.f32 %v1765_v32, %v1764_v37 }
 0x363   :  { %v1709_v23 = vpop.permute.xlu1 %1708  ;;  %v1705_v28 = vpop.permute.xlu0 %1704 }
 0x364   :  { %v1743_v56 = vmul.f32 %v1709_v23, %v1621_v24  ;;  %v1742_v2 = vmul.f32 %v1705_v28, %v1620_v48  ;;  %v1772_v43 = vrot.slane %v1771_v51, 4  ;;  %v1752_v24 = vadd.f32 %v1751_v25, %v1750_v19 }
 0x365   :  { %v1640_v48 = vadd.f32 %v1636_v38, %v1554_v55  ;;  %v1767_v15 = vrot.slane %v1766_v16, 2  ;;  %v1762_v23 = vrot.slane %v1761_v41, 1 }
 0x366   :  { %v1778_v46 = vadd.f32 %v1743_v56, %v1742_v2  ;;  %v1773_v42 = vadd.f32 %v1772_v43, %v1771_v51  ;;  %v1753_v40 = vrot.slane %v1752_v24, 2 }
 0x367   :  { %v1717_v49 = vpop.permute.xlu1 %1716  ;;  %v1713_v45 = vpop.permute.xlu0 %1712  ;;  %v1646_v50 = vmul.f32 %v2178_v3, %v1640_v48  ;;  %v1768_v22 = vadd.f32 %v1767_v15, %v1766_v16  ;;  %v1763_v25 = vadd.f32 %v1762_v23, %v1761_v41 }
 0x368   :  { %v1745_v8 = vmul.f32 %v1717_v49, %v1631_v17  ;;  %v1779_v20 = vrot.slane %v1778_v46, 4  ;;  %v1744_v62 = vmul.f32 %v1713_v45, %v1630_v29  ;;  %v1774_v7 = vrot.slane %v1773_v42, 2 }
 0x369   :  { %v1650_v17 = vadd.f32 %v1646_v50, %v1556_v59  ;;  %v1754_v19 = vadd.f32 %v1753_v40, %v1752_v24  ;;  %v1769_v28 = vrot.slane %v1768_v22, 1 }
 0x36a   :  { %v1780_v9 = vadd.f32 %v1779_v20, %v1778_v46  ;;  %v1785_v11 = vadd.f32 %v1745_v8, %v1744_v62  ;;  %v1775_v29 = vadd.f32 %v1774_v7, %v1773_v42 }
 0x36b   :  { %v1725_v4 = vpop.permute.xlu1 %1724  ;;  %v1721_v60 = vpop.permute.xlu0 %1720  ;;  %v1755_v26 = vrot.slane %v1754_v19, 1  ;;  %v1770_v46 = vadd.f32 %v1769_v28, %v1768_v22 }
 0x36c   :  { %v1747_v14 = vmul.f32 %v1725_v4, %v1641_v47  ;;  %v1786_v58 = vrot.slane %v1785_v11, 4  ;;  %v1746_v35 = vmul.f32 %v1721_v60, %v1640_v48  ;;  %v1781_v53 = vrot.slane %v1780_v9, 2  ;;  %v1829_v48 = vld [vmem:[#allocation4 + $0x8] sm:$0xff] }
 0x36d   :  { %v1776_v34 = vrot.slane %v1775_v29, 1  ;;  %v1756_v33 = vadd.f32 %v1755_v26, %v1754_v19  ;;  %v1831_v59 = vmul.f32 128.0, %v1829_v48 }
 0x36e   :  { %v1787_v39 = vadd.f32 %v1786_v58, %v1785_v11  ;;  %v1792_v0 = vadd.f32 %v1747_v14, %v1746_v35  ;;  %v1782_v13 = vadd.f32 %v1781_v53, %v1780_v9  ;;  %v2182_v9 = vpop.eup %2181 }
 0x36f   :  { %v1733_v30 = vpop.permute.xlu1 %1732  ;;  %v1729_v10 = vpop.permute.xlu0 %1728  ;;  %v1777_v57 = vadd.f32 %v1776_v34, %v1775_v29  ;;  %v1814_v47 = vsel %vm1181_vm6, %v1763_v25, %v1756_v33  ;;  %v257_v14 = vmul.f32 %v2182_v9, %v2614_v27 }
 0x370   :  { %v1749_v18 = vmul.f32 %v1733_v30, %v1651_v12  ;;  %v1788_v37 = vrot.slane %v1787_v39, 2  ;;  %v1793_v21 = vrot.slane %v1792_v0, 4  ;;  %v1748_v61 = vmul.f32 %v1729_v10, %v1650_v17 }
 0x371   :  { %v1783_v2 = vrot.slane %v1782_v13, 1  ;;  %v1815_v62 = vsel %vm1183_vm7, %v1770_v46, %v1814_v47 }
 0x372   :  { %v1794_v51 = vadd.f32 %v1793_v21, %v1792_v0  ;;  %v1789_v6 = vadd.f32 %v1788_v37, %v1787_v39  ;;  %v1799_v5 = vadd.f32 %v1749_v18, %v1748_v61  ;;  %v1816_v1 = vsel %vm1185_vm8, %v1777_v57, %v1815_v62 }
 0x373   :  { %v1784_v8 = vadd.f32 %v1783_v2, %v1782_v13 }
 0x374   :  { %v1795_v56 = vrot.slane %v1794_v51, 2  ;;  %v1800_v32 = vrot.slane %v1799_v5, 4  ;;  %v1790_v43 = vrot.slane %v1789_v6, 1 }
 0x375   :  { %v1817_v52 = vsel %vm1187_vm9, %v1784_v8, %v1816_v1 }
 0x376   :  { %v1796_v55 = vadd.f32 %v1795_v56, %v1794_v51  ;;  %v1801_v38 = vadd.f32 %v1800_v32, %v1799_v5  ;;  %v1791_v16 = vadd.f32 %v1790_v43, %v1789_v6 }
 0x378   :  { %v1797_v49 = vrot.slane %v1796_v55, 1  ;;  %v1802_v45 = vrot.slane %v1801_v38, 2  ;;  %v1818_v11 = vsel %vm1189_vm10, %v1791_v16, %v1817_v52 }
 0x37a   :  { %v1803_v20 = vadd.f32 %v1802_v45, %v1801_v38  ;;  %v1798_v24 = vadd.f32 %v1797_v49, %v1796_v55 }
 0x37c   :  { %v1804_v42 = vrot.slane %v1803_v20, 1  ;;  %v1819_v44 = vsel %vm1191_vm11, %v1798_v24, %v1818_v11 }
 0x37e   :  { %v1805_v4 = vadd.f32 %v1804_v42, %v1803_v20 }
 0x380   :  { %v1820_v60 = vsel %vm1193_vm12, %v1805_v4, %v1819_v44 }
 0x381   :  { %v1833_v36 = vadd.f32 %v1831_v59, %v1820_v60 }
 0x383   :  { %v1837_v3 = vmul.f32 %v1833_v36, %v257_v14 }
 0x385   :  { %v1838_v15 = vpack.c.bf16 %v1837_v3, %v2942_v31 }
 0x387   :  { %2013 = vmatmul.mubr.bf16.vlgmr.msra.gmra.mrb[4].mxu0 %v1838_v15 }
 0x45a   :  { %v1937_v58 = vpop.f32.mrb[4].mxu0 }
 0x45b   :  { %1944 = vst.msk [vmem:[#allocation25] sm:$0xff] %vm197_vm0, %v1937_v58  ;;  %v2014_v35 = vpop.f32.mrb[5].mxu0 }
 0x45c   :  { %v1940_v40 = vpop.f32.mrb[6].mxu0 }
 0x45d   :  { %1945 = vst.msk [vmem:[#allocation25 + $0x8] sm:$0xff] %vm197_vm0, %v1940_v40  ;;  %v2015_v7 = vpop.f32.mrb[7].mxu0 }
 0x45e   :  { %2370 = shalt.err (!%p2367_p12)
}
 0x45f   :  { %s2371_s20 = scalar_lea.hbm %s3019_s8, 256 }
 0x460   :  { %p2372_p13 = scmp.ne.s32.totalorder %s3019_s8, %s2371_s20  ;;  %p2375_p0 = scmp.lt.u32.totalorder %s2371_s20, %s3019_s8 }
 0x462   :  { %p2377_p1 = pnand %p2375_p0, %p2372_p13 }
 0x464   :  { %2380 = shalt.err (!%p2377_p1)
}
 0x465   :  { %1957 = dma.vmem_to_hbm [thread:$0]  %s1952_s12, 256, %s3019_s8, [#allocation13], %s2395_s17, %s2395_s17, %s2396_s18  }
 0x466   :  { %2391 = dma.done.wait [#allocation13], 256  }
 0x467   :  { %2392 = vsyncadd [#allocation13], 4294967040 }
 0x468   :  { %1961 = vsyncpa [#allocation12], 1 }
 0x469   :  { %1962 = vsyncpa [#allocation15], 1 }
 0x46a   :  { %1963 = vsyncpa [#allocation18], 1 }
 0x46b   :  { %1964 = vsyncpa [#allocation21], 1 }
 0x46c   :  { %1965 = vsyncpa [#allocation24], 1 }
 0x46d   :  { %1966 = vsyncpa [#allocation13], 1 }

</bundles_post_ra>
